<compile_context>
chip_gen: v7x
topology: tpu7x:2x2x1
jax: 0.10.0
libtpu: 0.0.40
codegen_flags: <defaults>
</compile_context>

<pallas_src>
import jax
import jax.numpy as jnp
from jax import lax
from jax.experimental import pallas as pl
from jax.experimental.pallas import tpu as pltpu

# Small synthetic config.
B = 2        # batch
S = 8        # sequence length
H = 32       # hidden size
NH = 4       # attention heads
DH = H // NH
F = 64       # FFN intermediate size
L = 2        # number of transformer layers
V = 101      # vocab size
LN_EPS = 1e-12

# Column layout of the packed "H-row" weight buffer: [ Wqkv | Wo | W1 ].
QKV_W = 3 * H            # 96
WO_OFF = QKV_W           # 96
W1_OFF = QKV_W + H       # 128
W_IN_COLS = QKV_W + H + F  # 192
SP_ROWS = 8              # small-param rows: bqkv, bo, b1, b2, g1, be1, g2, be2
SP_COLS = QKV_W          # 96 (widest small param)


def _layernorm(x, g, b):
    mu = jnp.mean(x, axis=-1, keepdims=True)
    var = jnp.mean(jnp.square(x - mu), axis=-1, keepdims=True)
    return (x - mu) * lax.rsqrt(var + LN_EPS) * g + b


def _encoder_kernel(x_ref, mb_ref, w_in_ref, w2_ref, sp_ref, o_ref):
    """One batch row per grid step; all L layers inline, weights VMEM-resident."""
    x = x_ref[0]                          # (S, H) f32 activation
    mb = mb_ref[0]                        # (1, S) additive key mask

    for l in range(L):                    # L is tiny & static: fully unrolled
        w_in = w_in_ref[l]                # (H, 192) bf16 : [Wqkv | Wo | W1]
        w2 = w2_ref[l]                    # (F, H)   bf16
        sp = sp_ref[l]                    # (8, 96)  f32 packed small params

        bqkv = sp[0:1, :]                 # (1, 3H)
        bo   = sp[1:2, 0:H]
        b1   = sp[2:3, 0:F]
        b2   = sp[3:4, 0:H]
        g1   = sp[4:5, 0:H]
        be1  = sp[5:6, 0:H]
        g2   = sp[6:7, 0:H]
        be2  = sp[7:8, 0:H]

        # ---- attention: fused lane-dense QKV projection (one MXU matmul) ----
        qkv = jnp.dot(x.astype(jnp.bfloat16), w_in[:, 0:QKV_W],
                      preferred_element_type=jnp.float32) + bqkv   # (S, 3H) f32
        qkv16 = qkv.astype(jnp.bfloat16)

        # Per-head masked-softmax attention; all 2D, no transposes
        # (contraction over the minor dim of both operands).
        ctx_parts = []
        for h in range(NH):
            qh = qkv16[:, h * DH:(h + 1) * DH]                     # (S, DH)
            kh = qkv16[:, H + h * DH: H + (h + 1) * DH]            # (S, DH)
            vh = qkv16[:, 2 * H + h * DH: 2 * H + (h + 1) * DH]    # (S, DH)
            s = lax.dot_general(qh, kh, (((1,), (1,)), ((), ())),
                                preferred_element_type=jnp.float32)  # (S, S)
            s = s + mb
            s = s - jnp.max(s, axis=-1, keepdims=True)
            p = jnp.exp(s)                                          # f32 softmax
            p = p * pl.reciprocal(jnp.sum(p, axis=-1, keepdims=True),
                                  approx=True)
            ctx_parts.append(jnp.dot(p.astype(jnp.bfloat16), vh,
                                     preferred_element_type=jnp.float32))
        ctx = jnp.concatenate(ctx_parts, axis=-1)                   # (S, NH*DH=H)

        # Single head-concatenated output projection (MXU does the head sum).
        attn = jnp.dot(ctx.astype(jnp.bfloat16), w_in[:, WO_OFF:WO_OFF + H],
                       preferred_element_type=jnp.float32) + bo
        x = _layernorm(x + attn, g1, be1)

        # ---- GELU feed-forward (2D bf16 MXU matmuls, f32 accumulation) ----
        h1 = jnp.dot(x.astype(jnp.bfloat16), w_in[:, W1_OFF:W1_OFF + F],
                     preferred_element_type=jnp.float32) + b1       # (S, F)
        # TODO(synk): HF BERT uses exact erf-GELU; tanh approximation used here.
        h1 = jax.nn.gelu(h1, approximate=True)
        ffn = jnp.dot(h1.astype(jnp.bfloat16), w2,
                      preferred_element_type=jnp.float32) + b2      # (S, H)
        x = _layernorm(x + ffn, g2, be2)

    # Output written exactly once (no per-layer redundant stores).
    o_ref[0] = x.astype(o_ref.dtype)


def transformer_stack(x3, mask_bias, w_in, w2, smallp):
    """x3: (B,S,H) f32, mask_bias: (B,1,S) f32, packed weights stacked over L."""
    return pl.pallas_call(
        _encoder_kernel,
        out_shape=jax.ShapeDtypeStruct((B, S, H), jnp.float32),
        grid=(B,),
        in_specs=[
            pl.BlockSpec((1, S, H), lambda b: (b, 0, 0)),              # x
            pl.BlockSpec((1, 1, S), lambda b: (b, 0, 0)),              # mask bias
            pl.BlockSpec((L, H, W_IN_COLS), lambda b: (0, 0, 0)),      # [Wqkv|Wo|W1]
            pl.BlockSpec((L, F, H), lambda b: (0, 0, 0)),              # W2
            pl.BlockSpec((L, SP_ROWS, SP_COLS), lambda b: (0, 0, 0)),  # small params
        ],
        out_specs=pl.BlockSpec((1, S, H), lambda b: (b, 0, 0)),
        compiler_params=pltpu.CompilerParams(
            dimension_semantics=("parallel",)),   # batch rows are independent
    )(x3, mask_bias, w_in, w2, smallp)


def init_params(key):
    std = 0.02
    scale = 1.0 / (DH ** 0.5)
    ks = jax.random.split(key, 8)

    tok_emb = std * jax.random.normal(ks[0], (V, H), jnp.float32)
    pos_emb = std * jax.random.normal(ks[1], (S, H), jnp.float32)
    emb_g = jnp.ones((1, H), jnp.float32)
    emb_b = jnp.zeros((1, H), jnp.float32)

    # Per-layer weights stacked along a leading L axis.  Head h of Q/K/V lives
    # in output columns [h*DH, (h+1)*DH) (standard nn.Linear layout); the
    # 1/sqrt(DH) attention scale is folded into Wq once at init time.
    wq = std * jax.random.normal(ks[2], (L, H, H), jnp.float32) * scale
    wk = std * jax.random.normal(ks[3], (L, H, H), jnp.float32)
    wv = std * jax.random.normal(ks[4], (L, H, H), jnp.float32)
    wo = std * jax.random.normal(ks[5], (L, H, H), jnp.float32)
    w1 = std * jax.random.normal(ks[6], (L, H, F), jnp.float32)
    w2 = std * jax.random.normal(ks[7], (L, F, H), jnp.float32)

    # Packed bf16 MXU weights: all "H-row" matrices concatenated on columns.
    w_in = jnp.concatenate([wq, wk, wv, wo, w1], axis=-1).astype(jnp.bfloat16)
    w2 = w2.astype(jnp.bfloat16)

    # Small params (biases + LayerNorm affine) packed one-per-row, f32.
    def row(vec):
        return jnp.pad(vec, ((0, 0), (0, SP_COLS - vec.shape[-1])))

    bqkv = jnp.zeros((L, 3 * H), jnp.float32)   # scale fold is a no-op on zeros
    bo = jnp.zeros((L, H), jnp.float32)
    b1 = jnp.zeros((L, F), jnp.float32)
    b2 = jnp.zeros((L, H), jnp.float32)
    g1 = jnp.ones((L, H), jnp.float32)
    be1 = jnp.zeros((L, H), jnp.float32)
    g2 = jnp.ones((L, H), jnp.float32)
    be2 = jnp.zeros((L, H), jnp.float32)
    smallp = jnp.stack(
        [row(bqkv), row(bo), row(b1), row(b2),
         row(g1), row(be1), row(g2), row(be2)], axis=1)   # (L, 8, 96)

    return {"tok_emb": tok_emb, "pos_emb": pos_emb,
            "emb_g": emb_g, "emb_b": emb_b,
            "w_in": w_in, "w2": w2, "smallp": smallp}


def text_encoder_forward(params, captions, mask):
    """captions: (B,S) int32 ids, mask: (B,S) {0,1}.  Returns (words_emb, sent_emb)."""
    # Embedding lookup + positional embedding + embedding LayerNorm (JAX glue:
    # the token gather has no clean small-Pallas equivalent).
    x = params["tok_emb"][captions] + params["pos_emb"][None, :, :]
    x = _layernorm(x, params["emb_g"][None], params["emb_b"][None])
    x = x.astype(jnp.float32)                                   # (B, S, H)

    # Additive key mask, HF-style: (1 - mask) * -1e9, one row per batch.
    neg = (1.0 - mask.astype(jnp.float32)) * (-1e9)             # (B, S)
    mask_bias = neg[:, None, :]                                 # (B, 1, S)

    hidden = transformer_stack(x, mask_bias,
                               params["w_in"], params["w2"], params["smallp"])

    # TextEncoder.forward split (spec returns hidden[:, 1:, :] untransposed).
    sent_emb = hidden[:, 0, :]
    words_emb = hidden[:, 1:, :]
    return words_emb, sent_emb


if __name__ == "__main__":
    key = jax.random.PRNGKey(0)
    pkey, ckey = jax.random.split(key)
    params = init_params(pkey)

    captions = jax.random.randint(ckey, (B, S), 0, V, dtype=jnp.int32)
    # Attention mask: first sample fully valid, second has 2 padding tokens.
    mask = jnp.array([[1] * S, [1] * (S - 2) + [0] * 2], dtype=jnp.int32)

    words_emb, sent_emb = text_encoder_forward(params, captions, mask)
    jax.block_until_ready((words_emb, sent_emb))

    assert words_emb.shape == (B, S - 1, H)
    assert sent_emb.shape == (B, H)
    print("KERNEL_OK")
</pallas_src>

<mosaic_0001>
module attributes {stable_mosaic.version = 11 : i64} {
  func.func @_encoder_kernel(%arg0: i32, %arg1: memref<1x8x32xf32, #tpu.memory_space<vmem>>, %arg2: memref<1x1x8xf32, #tpu.memory_space<vmem>>, %arg3: memref<2x32x192xbf16, #tpu.memory_space<vmem>>, %arg4: memref<2x64x32xbf16, #tpu.memory_space<vmem>>, %arg5: memref<2x8x96xf32, #tpu.memory_space<vmem>>, %arg6: memref<1x8x32xf32, #tpu.memory_space<vmem>>) attributes {dimension_semantics = [#tpu.dimension_semantics<parallel>], iteration_bounds = array<i64: 2>, scalar_prefetch = 0 : i64, scratch_operands = 0 : i64, tpu.core_type = #tpu.core_type<tc>, window_params = [{transform_indices = @transform_0, window_bounds = array<i64: 1, 8, 32>}, {transform_indices = @transform_1, window_bounds = array<i64: 1, 1, 8>}, {pipeline_mode = #tpu.pipeline_mode<synchronous>, transform_indices = @transform_2, window_bounds = array<i64: 2, 32, 192>}, {pipeline_mode = #tpu.pipeline_mode<synchronous>, transform_indices = @transform_3, window_bounds = array<i64: 2, 64, 32>}, {pipeline_mode = #tpu.pipeline_mode<synchronous>, transform_indices = @transform_4, window_bounds = array<i64: 2, 8, 96>}, {transform_indices = @transform_5, window_bounds = array<i64: 1, 8, 32>}]} {
    %c0 = arith.constant 0 : index
    %c0_0 = arith.constant 0 : index
    %c0_1 = arith.constant 0 : index
    %0 = vector.load %arg1[%c0, %c0_0, %c0_1] : memref<1x8x32xf32, #tpu.memory_space<vmem>>, vector<1x8x32xf32>
    %1 = vector.shape_cast %0 : vector<1x8x32xf32> to vector<8x32xf32>
    %c0_2 = arith.constant 0 : index
    %c0_3 = arith.constant 0 : index
    %c0_4 = arith.constant 0 : index
    %2 = vector.load %arg2[%c0_2, %c0_3, %c0_4] : memref<1x1x8xf32, #tpu.memory_space<vmem>>, vector<1x1x8xf32>
    %3 = vector.shape_cast %2 : vector<1x1x8xf32> to vector<1x8xf32>
    %c0_5 = arith.constant 0 : index
    %c0_6 = arith.constant 0 : index
    %c0_7 = arith.constant 0 : index
    %4 = vector.load %arg3[%c0_5, %c0_6, %c0_7] : memref<2x32x192xbf16, #tpu.memory_space<vmem>>, vector<1x32x192xbf16>
    %5 = vector.shape_cast %4 : vector<1x32x192xbf16> to vector<32x192xbf16>
    %c0_8 = arith.constant 0 : index
    %c0_9 = arith.constant 0 : index
    %c0_10 = arith.constant 0 : index
    %6 = vector.load %arg4[%c0_8, %c0_9, %c0_10] : memref<2x64x32xbf16, #tpu.memory_space<vmem>>, vector<1x64x32xbf16>
    %7 = vector.shape_cast %6 : vector<1x64x32xbf16> to vector<64x32xbf16>
    %c0_11 = arith.constant 0 : index
    %c0_12 = arith.constant 0 : index
    %c0_13 = arith.constant 0 : index
    %8 = vector.load %arg5[%c0_11, %c0_12, %c0_13] : memref<2x8x96xf32, #tpu.memory_space<vmem>>, vector<1x8x96xf32>
    %9 = vector.shape_cast %8 : vector<1x8x96xf32> to vector<8x96xf32>
    %10 = vector.extract_strided_slice %9 {offsets = [0, 0], sizes = [1, 96], strides = [1, 1]} : vector<8x96xf32> to vector<1x96xf32>
    %11 = vector.extract_strided_slice %9 {offsets = [1, 0], sizes = [1, 32], strides = [1, 1]} : vector<8x96xf32> to vector<1x32xf32>
    %12 = vector.extract_strided_slice %9 {offsets = [2, 0], sizes = [1, 64], strides = [1, 1]} : vector<8x96xf32> to vector<1x64xf32>
    %13 = vector.extract_strided_slice %9 {offsets = [3, 0], sizes = [1, 32], strides = [1, 1]} : vector<8x96xf32> to vector<1x32xf32>
    %14 = vector.extract_strided_slice %9 {offsets = [4, 0], sizes = [1, 32], strides = [1, 1]} : vector<8x96xf32> to vector<1x32xf32>
    %15 = vector.extract_strided_slice %9 {offsets = [5, 0], sizes = [1, 32], strides = [1, 1]} : vector<8x96xf32> to vector<1x32xf32>
    %16 = vector.extract_strided_slice %9 {offsets = [6, 0], sizes = [1, 32], strides = [1, 1]} : vector<8x96xf32> to vector<1x32xf32>
    %17 = vector.extract_strided_slice %9 {offsets = [7, 0], sizes = [1, 32], strides = [1, 1]} : vector<8x96xf32> to vector<1x32xf32>
    %18 = arith.truncf %1 : vector<8x32xf32> to vector<8x32xbf16>
    %19 = vector.extract_strided_slice %5 {offsets = [0, 0], sizes = [32, 96], strides = [1, 1]} : vector<32x192xbf16> to vector<32x96xbf16>
    %cst = arith.constant dense<0.000000e+00> : vector<8x96xf32>
    %20 = tpu.matmul %18, %19, %cst {dimension_numbers = #tpu.dot_dimension_numbers<[1], [0], [0], [1], [0, 0, 1, 1], [], []>} : vector<8x32xbf16>, vector<32x96xbf16>, vector<8x96xf32> -> vector<8x96xf32>
    %21 = vector.broadcast %10 : vector<1x96xf32> to vector<8x96xf32>
    %22 = arith.addf %20, %21 : vector<8x96xf32>
    %23 = arith.truncf %22 : vector<8x96xf32> to vector<8x96xbf16>
    %24 = vector.extract_strided_slice %23 {offsets = [0, 0], sizes = [8, 8], strides = [1, 1]} : vector<8x96xbf16> to vector<8x8xbf16>
    %25 = vector.extract_strided_slice %23 {offsets = [0, 32], sizes = [8, 8], strides = [1, 1]} : vector<8x96xbf16> to vector<8x8xbf16>
    %26 = vector.extract_strided_slice %23 {offsets = [0, 64], sizes = [8, 8], strides = [1, 1]} : vector<8x96xbf16> to vector<8x8xbf16>
    %cst_14 = arith.constant dense<0.000000e+00> : vector<8x8xf32>
    %27 = tpu.matmul %24, %25, %cst_14 {dimension_numbers = #tpu.dot_dimension_numbers<[1], [1], [0], [0], [0, 0, 1, 0], [], []>} : vector<8x8xbf16>, vector<8x8xbf16>, vector<8x8xf32> -> vector<8x8xf32>
    %28 = vector.broadcast %3 : vector<1x8xf32> to vector<8x8xf32>
    %29 = arith.addf %27, %28 : vector<8x8xf32>
    %cst_15 = arith.constant dense<0xFF800000> : vector<8xf32>
    %30 = vector.multi_reduction <maximumf>, %29, %cst_15 [1] : vector<8x8xf32> to vector<8xf32>
    %31 = vector.shape_cast %30 : vector<8xf32> to vector<8x1xf32>
    %32 = vector.broadcast %31 : vector<8x1xf32> to vector<8x8xf32>
    %33 = arith.subf %29, %32 : vector<8x8xf32>
    %34 = math.exp %33 : vector<8x8xf32>
    %cst_16 = arith.constant dense<0.000000e+00> : vector<8xf32>
    %35 = vector.multi_reduction <add>, %34, %cst_16 [1] : vector<8x8xf32> to vector<8xf32>
    %36 = vector.shape_cast %35 : vector<8xf32> to vector<8x1xf32>
    %37 = tpu.reciprocal %36 {approx = true} : vector<8x1xf32> -> vector<8x1xf32>
    %38 = vector.broadcast %37 : vector<8x1xf32> to vector<8x8xf32>
    %39 = arith.mulf %34, %38 : vector<8x8xf32>
    %40 = arith.truncf %39 : vector<8x8xf32> to vector<8x8xbf16>
    %cst_17 = arith.constant dense<0.000000e+00> : vector<8x8xf32>
    %41 = tpu.matmul %40, %26, %cst_17 {dimension_numbers = #tpu.dot_dimension_numbers<[1], [0], [0], [1], [0, 0, 1, 1], [], []>} : vector<8x8xbf16>, vector<8x8xbf16>, vector<8x8xf32> -> vector<8x8xf32>
    %42 = vector.extract_strided_slice %23 {offsets = [0, 8], sizes = [8, 8], strides = [1, 1]} : vector<8x96xbf16> to vector<8x8xbf16>
    %43 = vector.extract_strided_slice %23 {offsets = [0, 40], sizes = [8, 8], strides = [1, 1]} : vector<8x96xbf16> to vector<8x8xbf16>
    %44 = vector.extract_strided_slice %23 {offsets = [0, 72], sizes = [8, 8], strides = [1, 1]} : vector<8x96xbf16> to vector<8x8xbf16>
    %cst_18 = arith.constant dense<0.000000e+00> : vector<8x8xf32>
    %45 = tpu.matmul %42, %43, %cst_18 {dimension_numbers = #tpu.dot_dimension_numbers<[1], [1], [0], [0], [0, 0, 1, 0], [], []>} : vector<8x8xbf16>, vector<8x8xbf16>, vector<8x8xf32> -> vector<8x8xf32>
    %46 = vector.broadcast %3 : vector<1x8xf32> to vector<8x8xf32>
    %47 = arith.addf %45, %46 : vector<8x8xf32>
    %cst_19 = arith.constant dense<0xFF800000> : vector<8xf32>
    %48 = vector.multi_reduction <maximumf>, %47, %cst_19 [1] : vector<8x8xf32> to vector<8xf32>
    %49 = vector.shape_cast %48 : vector<8xf32> to vector<8x1xf32>
    %50 = vector.broadcast %49 : vector<8x1xf32> to vector<8x8xf32>
    %51 = arith.subf %47, %50 : vector<8x8xf32>
    %52 = math.exp %51 : vector<8x8xf32>
    %cst_20 = arith.constant dense<0.000000e+00> : vector<8xf32>
    %53 = vector.multi_reduction <add>, %52, %cst_20 [1] : vector<8x8xf32> to vector<8xf32>
    %54 = vector.shape_cast %53 : vector<8xf32> to vector<8x1xf32>
    %55 = tpu.reciprocal %54 {approx = true} : vector<8x1xf32> -> vector<8x1xf32>
    %56 = vector.broadcast %55 : vector<8x1xf32> to vector<8x8xf32>
    %57 = arith.mulf %52, %56 : vector<8x8xf32>
    %58 = arith.truncf %57 : vector<8x8xf32> to vector<8x8xbf16>
    %cst_21 = arith.constant dense<0.000000e+00> : vector<8x8xf32>
    %59 = tpu.matmul %58, %44, %cst_21 {dimension_numbers = #tpu.dot_dimension_numbers<[1], [0], [0], [1], [0, 0, 1, 1], [], []>} : vector<8x8xbf16>, vector<8x8xbf16>, vector<8x8xf32> -> vector<8x8xf32>
    %60 = vector.extract_strided_slice %23 {offsets = [0, 16], sizes = [8, 8], strides = [1, 1]} : vector<8x96xbf16> to vector<8x8xbf16>
    %61 = vector.extract_strided_slice %23 {offsets = [0, 48], sizes = [8, 8], strides = [1, 1]} : vector<8x96xbf16> to vector<8x8xbf16>
    %62 = vector.extract_strided_slice %23 {offsets = [0, 80], sizes = [8, 8], strides = [1, 1]} : vector<8x96xbf16> to vector<8x8xbf16>
    %cst_22 = arith.constant dense<0.000000e+00> : vector<8x8xf32>
    %63 = tpu.matmul %60, %61, %cst_22 {dimension_numbers = #tpu.dot_dimension_numbers<[1], [1], [0], [0], [0, 0, 1, 0], [], []>} : vector<8x8xbf16>, vector<8x8xbf16>, vector<8x8xf32> -> vector<8x8xf32>
    %64 = vector.broadcast %3 : vector<1x8xf32> to vector<8x8xf32>
    %65 = arith.addf %63, %64 : vector<8x8xf32>
    %cst_23 = arith.constant dense<0xFF800000> : vector<8xf32>
    %66 = vector.multi_reduction <maximumf>, %65, %cst_23 [1] : vector<8x8xf32> to vector<8xf32>
    %67 = vector.shape_cast %66 : vector<8xf32> to vector<8x1xf32>
    %68 = vector.broadcast %67 : vector<8x1xf32> to vector<8x8xf32>
    %69 = arith.subf %65, %68 : vector<8x8xf32>
    %70 = math.exp %69 : vector<8x8xf32>
    %cst_24 = arith.constant dense<0.000000e+00> : vector<8xf32>
    %71 = vector.multi_reduction <add>, %70, %cst_24 [1] : vector<8x8xf32> to vector<8xf32>
    %72 = vector.shape_cast %71 : vector<8xf32> to vector<8x1xf32>
    %73 = tpu.reciprocal %72 {approx = true} : vector<8x1xf32> -> vector<8x1xf32>
    %74 = vector.broadcast %73 : vector<8x1xf32> to vector<8x8xf32>
    %75 = arith.mulf %70, %74 : vector<8x8xf32>
    %76 = arith.truncf %75 : vector<8x8xf32> to vector<8x8xbf16>
    %cst_25 = arith.constant dense<0.000000e+00> : vector<8x8xf32>
    %77 = tpu.matmul %76, %62, %cst_25 {dimension_numbers = #tpu.dot_dimension_numbers<[1], [0], [0], [1], [0, 0, 1, 1], [], []>} : vector<8x8xbf16>, vector<8x8xbf16>, vector<8x8xf32> -> vector<8x8xf32>
    %78 = vector.extract_strided_slice %23 {offsets = [0, 24], sizes = [8, 8], strides = [1, 1]} : vector<8x96xbf16> to vector<8x8xbf16>
    %79 = vector.extract_strided_slice %23 {offsets = [0, 56], sizes = [8, 8], strides = [1, 1]} : vector<8x96xbf16> to vector<8x8xbf16>
    %80 = vector.extract_strided_slice %23 {offsets = [0, 88], sizes = [8, 8], strides = [1, 1]} : vector<8x96xbf16> to vector<8x8xbf16>
    %cst_26 = arith.constant dense<0.000000e+00> : vector<8x8xf32>
    %81 = tpu.matmul %78, %79, %cst_26 {dimension_numbers = #tpu.dot_dimension_numbers<[1], [1], [0], [0], [0, 0, 1, 0], [], []>} : vector<8x8xbf16>, vector<8x8xbf16>, vector<8x8xf32> -> vector<8x8xf32>
    %82 = vector.broadcast %3 : vector<1x8xf32> to vector<8x8xf32>
    %83 = arith.addf %81, %82 : vector<8x8xf32>
    %cst_27 = arith.constant dense<0xFF800000> : vector<8xf32>
    %84 = vector.multi_reduction <maximumf>, %83, %cst_27 [1] : vector<8x8xf32> to vector<8xf32>
    %85 = vector.shape_cast %84 : vector<8xf32> to vector<8x1xf32>
    %86 = vector.broadcast %85 : vector<8x1xf32> to vector<8x8xf32>
    %87 = arith.subf %83, %86 : vector<8x8xf32>
    %88 = math.exp %87 : vector<8x8xf32>
    %cst_28 = arith.constant dense<0.000000e+00> : vector<8xf32>
    %89 = vector.multi_reduction <add>, %88, %cst_28 [1] : vector<8x8xf32> to vector<8xf32>
    %90 = vector.shape_cast %89 : vector<8xf32> to vector<8x1xf32>
    %91 = tpu.reciprocal %90 {approx = true} : vector<8x1xf32> -> vector<8x1xf32>
    %92 = vector.broadcast %91 : vector<8x1xf32> to vector<8x8xf32>
    %93 = arith.mulf %88, %92 : vector<8x8xf32>
    %94 = arith.truncf %93 : vector<8x8xf32> to vector<8x8xbf16>
    %cst_29 = arith.constant dense<0.000000e+00> : vector<8x8xf32>
    %95 = tpu.matmul %94, %80, %cst_29 {dimension_numbers = #tpu.dot_dimension_numbers<[1], [0], [0], [1], [0, 0, 1, 1], [], []>} : vector<8x8xbf16>, vector<8x8xbf16>, vector<8x8xf32> -> vector<8x8xf32>
    %96 = tpu.concatenate %41, %59, %77, %95 in 1 : vector<8x8xf32>, vector<8x8xf32>, vector<8x8xf32>, vector<8x8xf32> -> vector<8x32xf32>
    %97 = arith.truncf %96 : vector<8x32xf32> to vector<8x32xbf16>
    %98 = vector.extract_strided_slice %5 {offsets = [0, 96], sizes = [32, 32], strides = [1, 1]} : vector<32x192xbf16> to vector<32x32xbf16>
    %cst_30 = arith.constant dense<0.000000e+00> : vector<8x32xf32>
    %99 = tpu.matmul %97, %98, %cst_30 {dimension_numbers = #tpu.dot_dimension_numbers<[1], [0], [0], [1], [0, 0, 1, 1], [], []>} : vector<8x32xbf16>, vector<32x32xbf16>, vector<8x32xf32> -> vector<8x32xf32>
    %100 = vector.broadcast %11 : vector<1x32xf32> to vector<8x32xf32>
    %101 = arith.addf %99, %100 : vector<8x32xf32>
    %102 = arith.addf %1, %101 : vector<8x32xf32>
    %cst_31 = arith.constant dense<0.000000e+00> : vector<8xf32>
    %103 = vector.multi_reduction <add>, %102, %cst_31 [1] : vector<8x32xf32> to vector<8xf32>
    %104 = vector.shape_cast %103 : vector<8xf32> to vector<8x1xf32>
    %cst_32 = arith.constant 3.200000e+01 : f32
    %105 = vector.broadcast %cst_32 : f32 to vector<8x1xf32>
    %106 = arith.divf %104, %105 : vector<8x1xf32>
    %107 = vector.broadcast %106 : vector<8x1xf32> to vector<8x32xf32>
    %108 = arith.subf %102, %107 : vector<8x32xf32>
    %109 = arith.mulf %108, %108 : vector<8x32xf32>
    %cst_33 = arith.constant dense<0.000000e+00> : vector<8xf32>
    %110 = vector.multi_reduction <add>, %109, %cst_33 [1] : vector<8x32xf32> to vector<8xf32>
    %111 = vector.shape_cast %110 : vector<8xf32> to vector<8x1xf32>
    %cst_34 = arith.constant 3.200000e+01 : f32
    %112 = vector.broadcast %cst_34 : f32 to vector<8x1xf32>
    %113 = arith.divf %111, %112 : vector<8x1xf32>
    %114 = vector.broadcast %106 : vector<8x1xf32> to vector<8x32xf32>
    %115 = arith.subf %102, %114 : vector<8x32xf32>
    %cst_35 = arith.constant 9.99999996E-13 : f32
    %116 = vector.broadcast %cst_35 : f32 to vector<8x1xf32>
    %117 = arith.addf %113, %116 : vector<8x1xf32>
    %118 = math.rsqrt %117 : vector<8x1xf32>
    %119 = vector.broadcast %118 : vector<8x1xf32> to vector<8x32xf32>
    %120 = arith.mulf %115, %119 : vector<8x32xf32>
    %121 = vector.broadcast %14 : vector<1x32xf32> to vector<8x32xf32>
    %122 = arith.mulf %120, %121 : vector<8x32xf32>
    %123 = vector.broadcast %15 : vector<1x32xf32> to vector<8x32xf32>
    %124 = arith.addf %122, %123 : vector<8x32xf32>
    %125 = arith.truncf %124 : vector<8x32xf32> to vector<8x32xbf16>
    %126 = vector.extract_strided_slice %5 {offsets = [0, 128], sizes = [32, 64], strides = [1, 1]} : vector<32x192xbf16> to vector<32x64xbf16>
    %cst_36 = arith.constant dense<0.000000e+00> : vector<8x64xf32>
    %127 = tpu.matmul %125, %126, %cst_36 {dimension_numbers = #tpu.dot_dimension_numbers<[1], [0], [0], [1], [0, 0, 1, 1], [], []>} : vector<8x32xbf16>, vector<32x64xbf16>, vector<8x64xf32> -> vector<8x64xf32>
    %128 = vector.broadcast %12 : vector<1x64xf32> to vector<8x64xf32>
    %129 = arith.addf %127, %128 : vector<8x64xf32>
    %130 = arith.mulf %129, %129 : vector<8x64xf32>
    %131 = arith.mulf %129, %130 : vector<8x64xf32>
    %cst_37 = arith.constant 4.471500e-02 : f32
    %132 = vector.broadcast %cst_37 : f32 to vector<8x64xf32>
    %133 = arith.mulf %132, %131 : vector<8x64xf32>
    %134 = arith.addf %129, %133 : vector<8x64xf32>
    %cst_38 = arith.constant 0.797884583 : f32
    %135 = vector.broadcast %cst_38 : f32 to vector<8x64xf32>
    %136 = arith.mulf %135, %134 : vector<8x64xf32>
    %137 = math.tanh %136 : vector<8x64xf32>
    %cst_39 = arith.constant 1.000000e+00 : f32
    %138 = vector.broadcast %cst_39 : f32 to vector<8x64xf32>
    %139 = arith.addf %138, %137 : vector<8x64xf32>
    %cst_40 = arith.constant 5.000000e-01 : f32
    %140 = vector.broadcast %cst_40 : f32 to vector<8x64xf32>
    %141 = arith.mulf %140, %139 : vector<8x64xf32>
    %142 = arith.mulf %129, %141 : vector<8x64xf32>
    %143 = arith.truncf %142 : vector<8x64xf32> to vector<8x64xbf16>
    %cst_41 = arith.constant dense<0.000000e+00> : vector<8x32xf32>
    %144 = tpu.matmul %143, %7, %cst_41 {dimension_numbers = #tpu.dot_dimension_numbers<[1], [0], [0], [1], [0, 0, 1, 1], [], []>} : vector<8x64xbf16>, vector<64x32xbf16>, vector<8x32xf32> -> vector<8x32xf32>
    %145 = vector.broadcast %13 : vector<1x32xf32> to vector<8x32xf32>
    %146 = arith.addf %144, %145 : vector<8x32xf32>
    %147 = arith.addf %124, %146 : vector<8x32xf32>
    %cst_42 = arith.constant dense<0.000000e+00> : vector<8xf32>
    %148 = vector.multi_reduction <add>, %147, %cst_42 [1] : vector<8x32xf32> to vector<8xf32>
    %149 = vector.shape_cast %148 : vector<8xf32> to vector<8x1xf32>
    %cst_43 = arith.constant 3.200000e+01 : f32
    %150 = vector.broadcast %cst_43 : f32 to vector<8x1xf32>
    %151 = arith.divf %149, %150 : vector<8x1xf32>
    %152 = vector.broadcast %151 : vector<8x1xf32> to vector<8x32xf32>
    %153 = arith.subf %147, %152 : vector<8x32xf32>
    %154 = arith.mulf %153, %153 : vector<8x32xf32>
    %cst_44 = arith.constant dense<0.000000e+00> : vector<8xf32>
    %155 = vector.multi_reduction <add>, %154, %cst_44 [1] : vector<8x32xf32> to vector<8xf32>
    %156 = vector.shape_cast %155 : vector<8xf32> to vector<8x1xf32>
    %cst_45 = arith.constant 3.200000e+01 : f32
    %157 = vector.broadcast %cst_45 : f32 to vector<8x1xf32>
    %158 = arith.divf %156, %157 : vector<8x1xf32>
    %159 = vector.broadcast %151 : vector<8x1xf32> to vector<8x32xf32>
    %160 = arith.subf %147, %159 : vector<8x32xf32>
    %cst_46 = arith.constant 9.99999996E-13 : f32
    %161 = vector.broadcast %cst_46 : f32 to vector<8x1xf32>
    %162 = arith.addf %158, %161 : vector<8x1xf32>
    %163 = math.rsqrt %162 : vector<8x1xf32>
    %164 = vector.broadcast %163 : vector<8x1xf32> to vector<8x32xf32>
    %165 = arith.mulf %160, %164 : vector<8x32xf32>
    %166 = vector.broadcast %16 : vector<1x32xf32> to vector<8x32xf32>
    %167 = arith.mulf %165, %166 : vector<8x32xf32>
    %168 = vector.broadcast %17 : vector<1x32xf32> to vector<8x32xf32>
    %169 = arith.addf %167, %168 : vector<8x32xf32>
    %c1 = arith.constant 1 : index
    %c0_47 = arith.constant 0 : index
    %c0_48 = arith.constant 0 : index
    %170 = vector.load %arg3[%c1, %c0_47, %c0_48] : memref<2x32x192xbf16, #tpu.memory_space<vmem>>, vector<1x32x192xbf16>
    %171 = vector.shape_cast %170 : vector<1x32x192xbf16> to vector<32x192xbf16>
    %c1_49 = arith.constant 1 : index
    %c0_50 = arith.constant 0 : index
    %c0_51 = arith.constant 0 : index
    %172 = vector.load %arg4[%c1_49, %c0_50, %c0_51] : memref<2x64x32xbf16, #tpu.memory_space<vmem>>, vector<1x64x32xbf16>
    %173 = vector.shape_cast %172 : vector<1x64x32xbf16> to vector<64x32xbf16>
    %c1_52 = arith.constant 1 : index
    %c0_53 = arith.constant 0 : index
    %c0_54 = arith.constant 0 : index
    %174 = vector.load %arg5[%c1_52, %c0_53, %c0_54] : memref<2x8x96xf32, #tpu.memory_space<vmem>>, vector<1x8x96xf32>
    %175 = vector.shape_cast %174 : vector<1x8x96xf32> to vector<8x96xf32>
    %176 = vector.extract_strided_slice %175 {offsets = [0, 0], sizes = [1, 96], strides = [1, 1]} : vector<8x96xf32> to vector<1x96xf32>
    %177 = vector.extract_strided_slice %175 {offsets = [1, 0], sizes = [1, 32], strides = [1, 1]} : vector<8x96xf32> to vector<1x32xf32>
    %178 = vector.extract_strided_slice %175 {offsets = [2, 0], sizes = [1, 64], strides = [1, 1]} : vector<8x96xf32> to vector<1x64xf32>
    %179 = vector.extract_strided_slice %175 {offsets = [3, 0], sizes = [1, 32], strides = [1, 1]} : vector<8x96xf32> to vector<1x32xf32>
    %180 = vector.extract_strided_slice %175 {offsets = [4, 0], sizes = [1, 32], strides = [1, 1]} : vector<8x96xf32> to vector<1x32xf32>
    %181 = vector.extract_strided_slice %175 {offsets = [5, 0], sizes = [1, 32], strides = [1, 1]} : vector<8x96xf32> to vector<1x32xf32>
    %182 = vector.extract_strided_slice %175 {offsets = [6, 0], sizes = [1, 32], strides = [1, 1]} : vector<8x96xf32> to vector<1x32xf32>
    %183 = vector.extract_strided_slice %175 {offsets = [7, 0], sizes = [1, 32], strides = [1, 1]} : vector<8x96xf32> to vector<1x32xf32>
    %184 = arith.truncf %169 : vector<8x32xf32> to vector<8x32xbf16>
    %185 = vector.extract_strided_slice %171 {offsets = [0, 0], sizes = [32, 96], strides = [1, 1]} : vector<32x192xbf16> to vector<32x96xbf16>
    %cst_55 = arith.constant dense<0.000000e+00> : vector<8x96xf32>
    %186 = tpu.matmul %184, %185, %cst_55 {dimension_numbers = #tpu.dot_dimension_numbers<[1], [0], [0], [1], [0, 0, 1, 1], [], []>} : vector<8x32xbf16>, vector<32x96xbf16>, vector<8x96xf32> -> vector<8x96xf32>
    %187 = vector.broadcast %176 : vector<1x96xf32> to vector<8x96xf32>
    %188 = arith.addf %186, %187 : vector<8x96xf32>
    %189 = arith.truncf %188 : vector<8x96xf32> to vector<8x96xbf16>
    %190 = vector.extract_strided_slice %189 {offsets = [0, 0], sizes = [8, 8], strides = [1, 1]} : vector<8x96xbf16> to vector<8x8xbf16>
    %191 = vector.extract_strided_slice %189 {offsets = [0, 32], sizes = [8, 8], strides = [1, 1]} : vector<8x96xbf16> to vector<8x8xbf16>
    %192 = vector.extract_strided_slice %189 {offsets = [0, 64], sizes = [8, 8], strides = [1, 1]} : vector<8x96xbf16> to vector<8x8xbf16>
    %cst_56 = arith.constant dense<0.000000e+00> : vector<8x8xf32>
    %193 = tpu.matmul %190, %191, %cst_56 {dimension_numbers = #tpu.dot_dimension_numbers<[1], [1], [0], [0], [0, 0, 1, 0], [], []>} : vector<8x8xbf16>, vector<8x8xbf16>, vector<8x8xf32> -> vector<8x8xf32>
    %194 = vector.broadcast %3 : vector<1x8xf32> to vector<8x8xf32>
    %195 = arith.addf %193, %194 : vector<8x8xf32>
    %cst_57 = arith.constant dense<0xFF800000> : vector<8xf32>
    %196 = vector.multi_reduction <maximumf>, %195, %cst_57 [1] : vector<8x8xf32> to vector<8xf32>
    %197 = vector.shape_cast %196 : vector<8xf32> to vector<8x1xf32>
    %198 = vector.broadcast %197 : vector<8x1xf32> to vector<8x8xf32>
    %199 = arith.subf %195, %198 : vector<8x8xf32>
    %200 = math.exp %199 : vector<8x8xf32>
    %cst_58 = arith.constant dense<0.000000e+00> : vector<8xf32>
    %201 = vector.multi_reduction <add>, %200, %cst_58 [1] : vector<8x8xf32> to vector<8xf32>
    %202 = vector.shape_cast %201 : vector<8xf32> to vector<8x1xf32>
    %203 = tpu.reciprocal %202 {approx = true} : vector<8x1xf32> -> vector<8x1xf32>
    %204 = vector.broadcast %203 : vector<8x1xf32> to vector<8x8xf32>
    %205 = arith.mulf %200, %204 : vector<8x8xf32>
    %206 = arith.truncf %205 : vector<8x8xf32> to vector<8x8xbf16>
    %cst_59 = arith.constant dense<0.000000e+00> : vector<8x8xf32>
    %207 = tpu.matmul %206, %192, %cst_59 {dimension_numbers = #tpu.dot_dimension_numbers<[1], [0], [0], [1], [0, 0, 1, 1], [], []>} : vector<8x8xbf16>, vector<8x8xbf16>, vector<8x8xf32> -> vector<8x8xf32>
    %208 = vector.extract_strided_slice %189 {offsets = [0, 8], sizes = [8, 8], strides = [1, 1]} : vector<8x96xbf16> to vector<8x8xbf16>
    %209 = vector.extract_strided_slice %189 {offsets = [0, 40], sizes = [8, 8], strides = [1, 1]} : vector<8x96xbf16> to vector<8x8xbf16>
    %210 = vector.extract_strided_slice %189 {offsets = [0, 72], sizes = [8, 8], strides = [1, 1]} : vector<8x96xbf16> to vector<8x8xbf16>
    %cst_60 = arith.constant dense<0.000000e+00> : vector<8x8xf32>
    %211 = tpu.matmul %208, %209, %cst_60 {dimension_numbers = #tpu.dot_dimension_numbers<[1], [1], [0], [0], [0, 0, 1, 0], [], []>} : vector<8x8xbf16>, vector<8x8xbf16>, vector<8x8xf32> -> vector<8x8xf32>
    %212 = vector.broadcast %3 : vector<1x8xf32> to vector<8x8xf32>
    %213 = arith.addf %211, %212 : vector<8x8xf32>
    %cst_61 = arith.constant dense<0xFF800000> : vector<8xf32>
    %214 = vector.multi_reduction <maximumf>, %213, %cst_61 [1] : vector<8x8xf32> to vector<8xf32>
    %215 = vector.shape_cast %214 : vector<8xf32> to vector<8x1xf32>
    %216 = vector.broadcast %215 : vector<8x1xf32> to vector<8x8xf32>
    %217 = arith.subf %213, %216 : vector<8x8xf32>
    %218 = math.exp %217 : vector<8x8xf32>
    %cst_62 = arith.constant dense<0.000000e+00> : vector<8xf32>
    %219 = vector.multi_reduction <add>, %218, %cst_62 [1] : vector<8x8xf32> to vector<8xf32>
    %220 = vector.shape_cast %219 : vector<8xf32> to vector<8x1xf32>
    %221 = tpu.reciprocal %220 {approx = true} : vector<8x1xf32> -> vector<8x1xf32>
    %222 = vector.broadcast %221 : vector<8x1xf32> to vector<8x8xf32>
    %223 = arith.mulf %218, %222 : vector<8x8xf32>
    %224 = arith.truncf %223 : vector<8x8xf32> to vector<8x8xbf16>
    %cst_63 = arith.constant dense<0.000000e+00> : vector<8x8xf32>
    %225 = tpu.matmul %224, %210, %cst_63 {dimension_numbers = #tpu.dot_dimension_numbers<[1], [0], [0], [1], [0, 0, 1, 1], [], []>} : vector<8x8xbf16>, vector<8x8xbf16>, vector<8x8xf32> -> vector<8x8xf32>
    %226 = vector.extract_strided_slice %189 {offsets = [0, 16], sizes = [8, 8], strides = [1, 1]} : vector<8x96xbf16> to vector<8x8xbf16>
    %227 = vector.extract_strided_slice %189 {offsets = [0, 48], sizes = [8, 8], strides = [1, 1]} : vector<8x96xbf16> to vector<8x8xbf16>
    %228 = vector.extract_strided_slice %189 {offsets = [0, 80], sizes = [8, 8], strides = [1, 1]} : vector<8x96xbf16> to vector<8x8xbf16>
    %cst_64 = arith.constant dense<0.000000e+00> : vector<8x8xf32>
    %229 = tpu.matmul %226, %227, %cst_64 {dimension_numbers = #tpu.dot_dimension_numbers<[1], [1], [0], [0], [0, 0, 1, 0], [], []>} : vector<8x8xbf16>, vector<8x8xbf16>, vector<8x8xf32> -> vector<8x8xf32>
    %230 = vector.broadcast %3 : vector<1x8xf32> to vector<8x8xf32>
    %231 = arith.addf %229, %230 : vector<8x8xf32>
    %cst_65 = arith.constant dense<0xFF800000> : vector<8xf32>
    %232 = vector.multi_reduction <maximumf>, %231, %cst_65 [1] : vector<8x8xf32> to vector<8xf32>
    %233 = vector.shape_cast %232 : vector<8xf32> to vector<8x1xf32>
    %234 = vector.broadcast %233 : vector<8x1xf32> to vector<8x8xf32>
    %235 = arith.subf %231, %234 : vector<8x8xf32>
    %236 = math.exp %235 : vector<8x8xf32>
    %cst_66 = arith.constant dense<0.000000e+00> : vector<8xf32>
    %237 = vector.multi_reduction <add>, %236, %cst_66 [1] : vector<8x8xf32> to vector<8xf32>
    %238 = vector.shape_cast %237 : vector<8xf32> to vector<8x1xf32>
    %239 = tpu.reciprocal %238 {approx = true} : vector<8x1xf32> -> vector<8x1xf32>
    %240 = vector.broadcast %239 : vector<8x1xf32> to vector<8x8xf32>
    %241 = arith.mulf %236, %240 : vector<8x8xf32>
    %242 = arith.truncf %241 : vector<8x8xf32> to vector<8x8xbf16>
    %cst_67 = arith.constant dense<0.000000e+00> : vector<8x8xf32>
    %243 = tpu.matmul %242, %228, %cst_67 {dimension_numbers = #tpu.dot_dimension_numbers<[1], [0], [0], [1], [0, 0, 1, 1], [], []>} : vector<8x8xbf16>, vector<8x8xbf16>, vector<8x8xf32> -> vector<8x8xf32>
    %244 = vector.extract_strided_slice %189 {offsets = [0, 24], sizes = [8, 8], strides = [1, 1]} : vector<8x96xbf16> to vector<8x8xbf16>
    %245 = vector.extract_strided_slice %189 {offsets = [0, 56], sizes = [8, 8], strides = [1, 1]} : vector<8x96xbf16> to vector<8x8xbf16>
    %246 = vector.extract_strided_slice %189 {offsets = [0, 88], sizes = [8, 8], strides = [1, 1]} : vector<8x96xbf16> to vector<8x8xbf16>
    %cst_68 = arith.constant dense<0.000000e+00> : vector<8x8xf32>
    %247 = tpu.matmul %244, %245, %cst_68 {dimension_numbers = #tpu.dot_dimension_numbers<[1], [1], [0], [0], [0, 0, 1, 0], [], []>} : vector<8x8xbf16>, vector<8x8xbf16>, vector<8x8xf32> -> vector<8x8xf32>
    %248 = vector.broadcast %3 : vector<1x8xf32> to vector<8x8xf32>
    %249 = arith.addf %247, %248 : vector<8x8xf32>
    %cst_69 = arith.constant dense<0xFF800000> : vector<8xf32>
    %250 = vector.multi_reduction <maximumf>, %249, %cst_69 [1] : vector<8x8xf32> to vector<8xf32>
    %251 = vector.shape_cast %250 : vector<8xf32> to vector<8x1xf32>
    %252 = vector.broadcast %251 : vector<8x1xf32> to vector<8x8xf32>
    %253 = arith.subf %249, %252 : vector<8x8xf32>
    %254 = math.exp %253 : vector<8x8xf32>
    %cst_70 = arith.constant dense<0.000000e+00> : vector<8xf32>
    %255 = vector.multi_reduction <add>, %254, %cst_70 [1] : vector<8x8xf32> to vector<8xf32>
    %256 = vector.shape_cast %255 : vector<8xf32> to vector<8x1xf32>
    %257 = tpu.reciprocal %256 {approx = true} : vector<8x1xf32> -> vector<8x1xf32>
    %258 = vector.broadcast %257 : vector<8x1xf32> to vector<8x8xf32>
    %259 = arith.mulf %254, %258 : vector<8x8xf32>
    %260 = arith.truncf %259 : vector<8x8xf32> to vector<8x8xbf16>
    %cst_71 = arith.constant dense<0.000000e+00> : vector<8x8xf32>
    %261 = tpu.matmul %260, %246, %cst_71 {dimension_numbers = #tpu.dot_dimension_numbers<[1], [0], [0], [1], [0, 0, 1, 1], [], []>} : vector<8x8xbf16>, vector<8x8xbf16>, vector<8x8xf32> -> vector<8x8xf32>
    %262 = tpu.concatenate %207, %225, %243, %261 in 1 : vector<8x8xf32>, vector<8x8xf32>, vector<8x8xf32>, vector<8x8xf32> -> vector<8x32xf32>
    %263 = arith.truncf %262 : vector<8x32xf32> to vector<8x32xbf16>
    %264 = vector.extract_strided_slice %171 {offsets = [0, 96], sizes = [32, 32], strides = [1, 1]} : vector<32x192xbf16> to vector<32x32xbf16>
    %cst_72 = arith.constant dense<0.000000e+00> : vector<8x32xf32>
    %265 = tpu.matmul %263, %264, %cst_72 {dimension_numbers = #tpu.dot_dimension_numbers<[1], [0], [0], [1], [0, 0, 1, 1], [], []>} : vector<8x32xbf16>, vector<32x32xbf16>, vector<8x32xf32> -> vector<8x32xf32>
    %266 = vector.broadcast %177 : vector<1x32xf32> to vector<8x32xf32>
    %267 = arith.addf %265, %266 : vector<8x32xf32>
    %268 = arith.addf %169, %267 : vector<8x32xf32>
    %cst_73 = arith.constant dense<0.000000e+00> : vector<8xf32>
    %269 = vector.multi_reduction <add>, %268, %cst_73 [1] : vector<8x32xf32> to vector<8xf32>
    %270 = vector.shape_cast %269 : vector<8xf32> to vector<8x1xf32>
    %cst_74 = arith.constant 3.200000e+01 : f32
    %271 = vector.broadcast %cst_74 : f32 to vector<8x1xf32>
    %272 = arith.divf %270, %271 : vector<8x1xf32>
    %273 = vector.broadcast %272 : vector<8x1xf32> to vector<8x32xf32>
    %274 = arith.subf %268, %273 : vector<8x32xf32>
    %275 = arith.mulf %274, %274 : vector<8x32xf32>
    %cst_75 = arith.constant dense<0.000000e+00> : vector<8xf32>
    %276 = vector.multi_reduction <add>, %275, %cst_75 [1] : vector<8x32xf32> to vector<8xf32>
    %277 = vector.shape_cast %276 : vector<8xf32> to vector<8x1xf32>
    %cst_76 = arith.constant 3.200000e+01 : f32
    %278 = vector.broadcast %cst_76 : f32 to vector<8x1xf32>
    %279 = arith.divf %277, %278 : vector<8x1xf32>
    %280 = vector.broadcast %272 : vector<8x1xf32> to vector<8x32xf32>
    %281 = arith.subf %268, %280 : vector<8x32xf32>
    %cst_77 = arith.constant 9.99999996E-13 : f32
    %282 = vector.broadcast %cst_77 : f32 to vector<8x1xf32>
    %283 = arith.addf %279, %282 : vector<8x1xf32>
    %284 = math.rsqrt %283 : vector<8x1xf32>
    %285 = vector.broadcast %284 : vector<8x1xf32> to vector<8x32xf32>
    %286 = arith.mulf %281, %285 : vector<8x32xf32>
    %287 = vector.broadcast %180 : vector<1x32xf32> to vector<8x32xf32>
    %288 = arith.mulf %286, %287 : vector<8x32xf32>
    %289 = vector.broadcast %181 : vector<1x32xf32> to vector<8x32xf32>
    %290 = arith.addf %288, %289 : vector<8x32xf32>
    %291 = arith.truncf %290 : vector<8x32xf32> to vector<8x32xbf16>
    %292 = vector.extract_strided_slice %171 {offsets = [0, 128], sizes = [32, 64], strides = [1, 1]} : vector<32x192xbf16> to vector<32x64xbf16>
    %cst_78 = arith.constant dense<0.000000e+00> : vector<8x64xf32>
    %293 = tpu.matmul %291, %292, %cst_78 {dimension_numbers = #tpu.dot_dimension_numbers<[1], [0], [0], [1], [0, 0, 1, 1], [], []>} : vector<8x32xbf16>, vector<32x64xbf16>, vector<8x64xf32> -> vector<8x64xf32>
    %294 = vector.broadcast %178 : vector<1x64xf32> to vector<8x64xf32>
    %295 = arith.addf %293, %294 : vector<8x64xf32>
    %296 = arith.mulf %295, %295 : vector<8x64xf32>
    %297 = arith.mulf %295, %296 : vector<8x64xf32>
    %cst_79 = arith.constant 4.471500e-02 : f32
    %298 = vector.broadcast %cst_79 : f32 to vector<8x64xf32>
    %299 = arith.mulf %298, %297 : vector<8x64xf32>
    %300 = arith.addf %295, %299 : vector<8x64xf32>
    %cst_80 = arith.constant 0.797884583 : f32
    %301 = vector.broadcast %cst_80 : f32 to vector<8x64xf32>
    %302 = arith.mulf %301, %300 : vector<8x64xf32>
    %303 = math.tanh %302 : vector<8x64xf32>
    %cst_81 = arith.constant 1.000000e+00 : f32
    %304 = vector.broadcast %cst_81 : f32 to vector<8x64xf32>
    %305 = arith.addf %304, %303 : vector<8x64xf32>
    %cst_82 = arith.constant 5.000000e-01 : f32
    %306 = vector.broadcast %cst_82 : f32 to vector<8x64xf32>
    %307 = arith.mulf %306, %305 : vector<8x64xf32>
    %308 = arith.mulf %295, %307 : vector<8x64xf32>
    %309 = arith.truncf %308 : vector<8x64xf32> to vector<8x64xbf16>
    %cst_83 = arith.constant dense<0.000000e+00> : vector<8x32xf32>
    %310 = tpu.matmul %309, %173, %cst_83 {dimension_numbers = #tpu.dot_dimension_numbers<[1], [0], [0], [1], [0, 0, 1, 1], [], []>} : vector<8x64xbf16>, vector<64x32xbf16>, vector<8x32xf32> -> vector<8x32xf32>
    %311 = vector.broadcast %179 : vector<1x32xf32> to vector<8x32xf32>
    %312 = arith.addf %310, %311 : vector<8x32xf32>
    %313 = arith.addf %290, %312 : vector<8x32xf32>
    %cst_84 = arith.constant dense<0.000000e+00> : vector<8xf32>
    %314 = vector.multi_reduction <add>, %313, %cst_84 [1] : vector<8x32xf32> to vector<8xf32>
    %315 = vector.shape_cast %314 : vector<8xf32> to vector<8x1xf32>
    %cst_85 = arith.constant 3.200000e+01 : f32
    %316 = vector.broadcast %cst_85 : f32 to vector<8x1xf32>
    %317 = arith.divf %315, %316 : vector<8x1xf32>
    %318 = vector.broadcast %317 : vector<8x1xf32> to vector<8x32xf32>
    %319 = arith.subf %313, %318 : vector<8x32xf32>
    %320 = arith.mulf %319, %319 : vector<8x32xf32>
    %cst_86 = arith.constant dense<0.000000e+00> : vector<8xf32>
    %321 = vector.multi_reduction <add>, %320, %cst_86 [1] : vector<8x32xf32> to vector<8xf32>
    %322 = vector.shape_cast %321 : vector<8xf32> to vector<8x1xf32>
    %cst_87 = arith.constant 3.200000e+01 : f32
    %323 = vector.broadcast %cst_87 : f32 to vector<8x1xf32>
    %324 = arith.divf %322, %323 : vector<8x1xf32>
    %325 = vector.broadcast %317 : vector<8x1xf32> to vector<8x32xf32>
    %326 = arith.subf %313, %325 : vector<8x32xf32>
    %cst_88 = arith.constant 9.99999996E-13 : f32
    %327 = vector.broadcast %cst_88 : f32 to vector<8x1xf32>
    %328 = arith.addf %324, %327 : vector<8x1xf32>
    %329 = math.rsqrt %328 : vector<8x1xf32>
    %330 = vector.broadcast %329 : vector<8x1xf32> to vector<8x32xf32>
    %331 = arith.mulf %326, %330 : vector<8x32xf32>
    %332 = vector.broadcast %182 : vector<1x32xf32> to vector<8x32xf32>
    %333 = arith.mulf %331, %332 : vector<8x32xf32>
    %334 = vector.broadcast %183 : vector<1x32xf32> to vector<8x32xf32>
    %335 = arith.addf %333, %334 : vector<8x32xf32>
    %c0_89 = arith.constant 0 : index
    %c0_90 = arith.constant 0 : index
    %c0_91 = arith.constant 0 : index
    %336 = vector.load %arg6[%c0_89, %c0_90, %c0_91] : memref<1x8x32xf32, #tpu.memory_space<vmem>>, vector<1x8x32xf32>
    %337 = vector.shape_cast %336 : vector<1x8x32xf32> to vector<8x32xf32>
    %338 = vector.shape_cast %335 : vector<8x32xf32> to vector<1x8x32xf32>
    tpu.vector_store %arg6[%c0_89, %c0_90, %c0_91], %338 {strides = array<i32>} : memref<1x8x32xf32, #tpu.memory_space<vmem>>, vector<1x8x32xf32>,
    return
  }
  func.func @transform_0(%arg0: i32) -> (i32, i32, i32) {
    %c0_i32 = arith.constant 0 : i32
    %c0_i32_0 = arith.constant 0 : i32
    %c0_i32_1 = arith.constant 0 : i32
    return %arg0, %c0_i32, %c0_i32_0 : i32, i32, i32
  }
  func.func @transform_1(%arg0: i32) -> (i32, i32, i32) {
    %c0_i32 = arith.constant 0 : i32
    %c0_i32_0 = arith.constant 0 : i32
    %c0_i32_1 = arith.constant 0 : i32
    return %arg0, %c0_i32, %c0_i32_0 : i32, i32, i32
  }
  func.func @transform_2(%arg0: i32) -> (i32, i32, i32) {
    %c0_i32 = arith.constant 0 : i32
    %c0_i32_0 = arith.constant 0 : i32
    %c0_i32_1 = arith.constant 0 : i32
    %c0_i32_2 = arith.constant 0 : i32
    return %c0_i32, %c0_i32_0, %c0_i32_1 : i32, i32, i32
  }
  func.func @transform_3(%arg0: i32) -> (i32, i32, i32) {
    %c0_i32 = arith.constant 0 : i32
    %c0_i32_0 = arith.constant 0 : i32
    %c0_i32_1 = arith.constant 0 : i32
    %c0_i32_2 = arith.constant 0 : i32
    return %c0_i32, %c0_i32_0, %c0_i32_1 : i32, i32, i32
  }
  func.func @transform_4(%arg0: i32) -> (i32, i32, i32) {
    %c0_i32 = arith.constant 0 : i32
    %c0_i32_0 = arith.constant 0 : i32
    %c0_i32_1 = arith.constant 0 : i32
    %c0_i32_2 = arith.constant 0 : i32
    return %c0_i32, %c0_i32_0, %c0_i32_1 : i32, i32, i32
  }
  func.func @transform_5(%arg0: i32) -> (i32, i32, i32) {
    %c0_i32 = arith.constant 0 : i32
    %c0_i32_0 = arith.constant 0 : i32
    %c0_i32_1 = arith.constant 0 : i32
    return %arg0, %c0_i32, %c0_i32_0 : i32, i32, i32
  }
}

</mosaic_0001>

<bundles_post_ra>
// kernel: tpu_custom_call.1
= control target key start
LH: loop header
LB: loop body
LE: loop exit
PB: predicated region body
PF: predicated region fallthrough
CT: control target
= control target key end

     0   :  { %10 = vsyncpa [#allocation3], 0  ;;  %s2868_s0 = inlined_call_operand.vmem [shape: f32[2,8,32], index: 0, kind: input, shape index: {}]   ;;  %s2869_s1 = inlined_call_operand.vmem [shape: f32[2,1,8], index: 1, kind: input, shape index: {}]   ;;  %s2870_s2 = inlined_call_operand.vmem [shape: bf16[2,32,192], index: 2, kind: input, shape index: {}]   ;;  %s2871_s3 = inlined_call_operand.vmem [shape: bf16[2,64,32], index: 3, kind: input, shape index: {}]   ;;  %s2872_s4 = inlined_call_operand.vmem [shape: f32[2,8,96], index: 4, kind: input, shape index: {}]   ;;  %s2873_s5 = inlined_call_operand.hbm [shape: f32[2,8,32], index: 5, kind: output, shape index: {}]  }
   0x1   :  { %12 = vsyncpa [#allocation3 + $0x1], 0  ;;  %s2394_s18 = smov 0   ;;  %s2396_s19 = smov 0  }
   0x2   :  { %s2398_s20 = smov 0   ;;  %s2400_s21 = smov 0  }
   0x3 LB: > { %s2415_s22 = sadd.s32 4294967295, %s2344_s21   ;;  %s1870_s23 = sadd.s32 4294967294, %s2344_s21   ;;  %s2344_s21 = sphi %s2400_s21, %s2892_s21   ;;  %s2340_s20 = sphi %s2398_s20, %s2891_s20   ;;  %s2336_s19 = sphi %s2396_s19, %s2890_s19   ;;  %s2332_s18 = sphi %s2394_s18, %s2889_s18  }
   0x4   : > { %s2419_s24 = sadd.s32 1, %s2344_s21   ;;  %s140_s25 = sadd.s32 1, %s2340_s20 }
   0x5   : > { %s137_s26 = ssub.s32 %s2344_s21, %s2419_s24  ;;  %p150_p0 = scmp.ne.s32.totalorder %s2340_s20, %s2336_s19 }
   0x6   : > { %p138_p1 = scmp.eq.s32.totalorder %s137_s26, 0  ;;  %p151_p2 = scmp.eq.s32.totalorder %s2415_s22, 1 }
   0x7   : > { %p156_p3 = scmp.ne.s32.totalorder %s2336_s19, %s2332_s18  ;;  %p157_p4 = scmp.eq.s32.totalorder %s1870_s23, 1 }
   0x8   : > { %s2430_s27 = scalar_select %p138_p1, %s2340_s20, %s140_s25  }
   0x9   : > { %p2432_p5 = por %p151_p2, %p150_p0  ;;  %p2436_p6 = por %p157_p4, %p156_p3 }
   0xa   : > { %p1873_p7 = scmp.ge.s32.totalorder %s2344_s21, 1  ;;  %p197_p8 = scmp.lt.s32.totalorder %s2344_s21, 3 }
   0xc   : > { %p198_p9 = pnand %p1873_p7, %p197_p8 }
   0xd   : > { %v2445_v0 = vld [vmem:[%s2870_s2] ss:$8 sps:$4 sm:$0xff] (!%p198_p9)   ;;  %v2346_v1 = vmov (!%p198_p9), 0.0   ;;  %vm2347_vm0 = vmmov (!%p198_p9), 0   ;;  %p227_p10 = scmp.lt.s32.totalorder (!%p198_p9), %s2415_s22, 1  ;;  %vm267_vm1 = vcmask (!%p198_p9), 261120   ;;  %v251_v5 = vlaneseq (!%p198_p9) }
   0xe   : > { %201 = sbr.rel (%p198_p9) target bundleno = 5172 (0x1434), region = 40  ;;  %1994 = vmatprep.subr.bf16.mxu1 (!%p198_p9), %v2346_v1  ;;  %1998 = vmatprep.mubr.msk.bf16.mxu1 (!%p198_p9), %vm2347_vm0, %v2346_v1  ;;  %v2455_v2 = vld [vmem:[%s2870_s2 + $0x10] ss:$8 sps:$4 sm:$0xff] (!%p198_p9)   ;;  %v2483_v8 = vld [vmem:[%s2872_s4] sm:$0xff] (!%p198_p9)  ;;  %s2348_s16 = smov (!%p198_p9), 120   ;;  %vm321_vm2 = vcmask (!%p198_p9), 64512  }
   0xf   : > { %1995 = vmatpush3.bf16.msra.mxu1 (!%p198_p9), %v2445_v0  ;;  %2008 = vmatprep.subr.bf16.mxu0 (!%p198_p9), %v2346_v1  ;;  %v2477_v6 = vshrl.u32 (!%p198_p9), %v251_v5, 7  ;;  %s2349_s17 = smov (!%p198_p9), 96   ;;  %s2350_s23 = smov (!%p198_p9), 80   ;;  %vm385_vm3 = vcmask (!%p198_p9), 1043456   ;;  %vm772_vm4 = vcmask (!%p198_p9), 130048   ;;  %vm774_vm5 = vcmask (!%p198_p9), 195584  }
  0x10   : > { %1996 = vmatprep.subr.bf16.mxu1 (!%p198_p9), %v2346_v1  ;;  %2010 = vmatprep.mubr.msk.bf16.mxu0 (!%p198_p9), %vm2347_vm0, %v2346_v1  ;;  %s2351_s25 = smov (!%p198_p9), 88   ;;  %s2352_s26 = smov (!%p198_p9), 72   ;;  %vm949_vm6 = vcmask (!%p198_p9), 523264  }
  0x11   : > { %v253_v7 = vsub.s32 (!%p198_p9), 0, %v2477_v6  ;;  %s2353_s30 = smov (!%p198_p9), 112   ;;  %s2354_s6 = smov (!%p198_p9), 104  }
  0x12   : > { %s2356_s11 = smov (!%p198_p9), 64   ;;  %s2880_s12 = smov (!%p198_p9), 40  }
  0x13   : > { %1997 = vmatpush3.bf16.msra.mxu1 (!%p198_p9), %v2455_v2  ;;  %v254_v9 = vrot.slane (!%p198_p9), %v2483_v8, %v253_v7  ;;  %s2876_s14 = smov (!%p198_p9), 8   ;;  %s2875_s15 = smov (!%p198_p9), 16  }
  0x14   : > { %2002 = vmatprep.subr.bf16.mxu1 (!%p198_p9), %v2346_v1  ;;  %s2874_s7 = smov (!%p198_p9), 24  }
  0x15   : > { %s2460_s9 = scalar_select %p227_p10, %s2415_s22, 1 }
  0x17   : > { %s1875_s10 = sshll.u32 %s2460_s9, 3 }
  0x18   : > { %s230_s13 = scalar_lea.vmem %s2868_s0, %s1875_s10  ;;  %s233_s10 = scalar_lea.vmem %s2869_s1, %s2460_s9 }
  0x19   : > { %v2469_v3 = vld [vmem:[%s230_s13] sm:$0xff]  ;;  %s2355_s9 = smov 56   ;;  %s2879_s13 = smov 48  }
  0x1a   : > { %v250_v4 = vpack.c.bf16 %v2469_v3, %v2469_v3  ;;  %v2529_v27 = vld [vmem:[%s233_s10] ss:$0 sm:$0xff]  ;;  %s2877_s10 = smov 32  }
  0x1c   : > { %1999 = vmatmul.mubr.msk.bf16.vlgmr.msra.gmra.mrb[0].mxu1 %vm267_vm1, %v250_v4 }
  0x1d   : > { %2004 = vmatprep.mubr.msk.bf16.mxu1 %vm2347_vm0, %v2346_v1 }
  0xef   : > { %v305_v10 = vpop.f32.mrb[0].mxu1 }
  0xf0   : > { %v306_v11 = vadd.f32 %v305_v10, %v254_v9  ;;  %v2000_v12 = vpop.f32.mrb[1].mxu1 }
  0xf1   : > { %v308_v13 = vpop.f32.mrb[2].mxu1 }
  0xf2   : > { %v2488_v14 = vpack.c.bf16 %v306_v11, %v306_v11  ;;  %v2001_v15 = vpop.f32.mrb[3].mxu1 }
  0xf4   : > { %429 = vrot.lane.b32.xlu1 %v2488_v14, %s2348_s16  ;;  %319 = vrot.lane.b32.xlu0 %v2488_v14, %s2349_s17 }
  0xf8   : > { %541 = vrot.lane.b32.xlu1 %v2488_v14, %s2350_s23  ;;  %431 = vrot.lane.b32.xlu0 %v2488_v14, %s2351_s25 }
  0xfc   : > { %651 = vrot.lane.b32.xlu1 %v2488_v14, %s2352_s26  ;;  %539 = vrot.lane.b32.xlu0 %v2488_v14, %s2353_s30 }
 0x100   : > { %649 = vrot.lane.b32.xlu0 %v2488_v14, %s2354_s6 }
 0x166   : > { %v320_v16 = vpop.permute.xlu0 %319  ;;  %v430_v19 = vpop.permute.xlu1 %429 }
 0x167   : > { %v326_v17 = vsel %vm321_vm2, %v320_v16, 0 }
 0x168   : > { %2003 = vmatpush3.bf16.xpose.msra.mxu1 %v326_v17 }
 0x169   : > { %2014 = vmatprep.subr.bf16.mxu1 %v2346_v1 }
 0x16a   : > { %v432_v18 = vpop.permute.xlu0 %431  ;;  %v542_v21 = vpop.permute.xlu1 %541 }
 0x16b   : > { %v437_v20 = vsel %vm321_vm2, %v432_v18, 0  ;;  %v547_v22 = vsel %vm321_vm2, %v542_v21, 0 }
 0x16e   : > { %v652_v23 = vpop.permute.xlu1 %651  ;;  %v540_v24 = vpop.permute.xlu0 %539 }
 0x16f   : > { %2005 = vmatmul.mubr.msk.bf16.vlgmr.msra.gmra.mrb[4].mxu1 %vm321_vm2, %v2488_v14  ;;  %v657_v25 = vsel %vm321_vm2, %v652_v23, 0 }
 0x170   : > { %2015 = vmatpush3.bf16.xpose.msra.mxu1 %v437_v20  ;;  %2016 = vmatprep.mubr.msk.bf16.mxu1 %vm2347_vm0, %v2346_v1 }
 0x171   : > { %2026 = vmatprep.subr.bf16.mxu1 %v2346_v1 }
 0x172   : > { %v650_v26 = vpop.permute.xlu0 %649 }
 0x177   : > { %2017 = vmatmul.mubr.msk.bf16.vlgmr.msra.gmra.mrb[8].mxu1 %vm321_vm2, %v430_v19 }
 0x178   : > { %2027 = vmatpush3.bf16.xpose.msra.mxu1 %v547_v22  ;;  %2028 = vmatprep.mubr.msk.bf16.mxu1 %vm2347_vm0, %v2346_v1 }
 0x179   : > { %2038 = vmatprep.subr.bf16.mxu1 %v2346_v1 }
 0x17f   : > { %2029 = vmatmul.mubr.msk.bf16.vlgmr.msra.gmra.mrb[12].mxu1 %vm321_vm2, %v540_v24 }
 0x180   : > { %2039 = vmatpush3.bf16.xpose.msra.mxu1 %v657_v25  ;;  %2040 = vmatprep.mubr.msk.bf16.mxu1 %vm2347_vm0, %v2346_v1 }
 0x181   : > { %2050 = vmatprep.subr.bf16.mxu1 %v2346_v1 }
 0x187   : > { %2041 = vmatmul.mubr.msk.bf16.vlgmr.msra.gmra.mrb[16].mxu1 %vm321_vm2, %v650_v26 }
 0x188   : > { %2054 = vmatprep.mubr.msk.bf16.mxu1 %vm2347_vm0, %v2346_v1 }
 0x242   : > { %v362_v28 = vpop.f32.mrb[4].mxu1 }
 0x243   : > { %v363_v29 = vadd.f32 %v2529_v27, %v362_v28  ;;  %v2006_v30 = vpop.f32.mrb[5].mxu1 }
 0x244   : > { %v365_v31 = vpop.f32.mrb[6].mxu1 }
 0x245   : > { %v2007_v32 = vpop.f32.mrb[7].mxu1  ;;  %v368_v33 = vsel %vm321_vm2, %v363_v29, -inf }
 0x246   : > { %369 = vmax.xlane.f32.xlu1 %v368_v33 }
 0x24a   : > { %v473_v34 = vpop.f32.mrb[8].mxu1 }
 0x24b   : > { %v474_v35 = vadd.f32 %v2529_v27, %v473_v34  ;;  %v2018_v36 = vpop.f32.mrb[9].mxu1 }
 0x24c   : > { %v476_v37 = vpop.f32.mrb[10].mxu1 }
 0x24d   : > { %v2019_v38 = vpop.f32.mrb[11].mxu1  ;;  %v479_v39 = vsel %vm321_vm2, %v474_v35, -inf }
 0x24e   : > { %480 = vmax.xlane.f32.xlu0 %v479_v39  ;;  %v2220_v39 = vld [vmem:[%s2870_s2 + $0x4] ss:$8 sps:$4 sm:$0xff]  }
 0x252   : > { %v583_v40 = vpop.f32.mrb[12].mxu1 }
 0x253   : > { %v584_v41 = vadd.f32 %v2529_v27, %v583_v40  ;;  %v2030_v42 = vpop.f32.mrb[13].mxu1 }
 0x254   : > { %v586_v43 = vpop.f32.mrb[14].mxu1 }
 0x255   : > { %v2031_v44 = vpop.f32.mrb[15].mxu1  ;;  %v589_v45 = vsel %vm321_vm2, %v584_v41, -inf }
 0x256   : > { %590 = vmax.xlane.f32.xlu0 %v589_v45 }
 0x25a   : > { %v693_v46 = vpop.f32.mrb[16].mxu1 }
 0x25b   : > { %v694_v47 = vadd.f32 %v2529_v27, %v693_v46  ;;  %v2042_v48 = vpop.f32.mrb[17].mxu1 }
 0x25c   : > { %v696_v49 = vpop.f32.mrb[18].mxu1 }
 0x25d   : > { %v2043_v50 = vpop.f32.mrb[19].mxu1  ;;  %v699_v51 = vsel %vm321_vm2, %v694_v47, -inf }
 0x25e   : > { %700 = vmax.xlane.f32.xlu1 %v699_v51 }
 0x2d3   : > { %v370_v52 = vpop.xlane.xlu1 %369 }
 0x2d4   : > { %v371_v53 = vsub.f32 %v363_v29, %v370_v52 }
 0x2d6   : > { %v372_v54 = vmul.f32 1.442695, %v371_v53 }
 0x2d8   : > { %2238 = vpow2.f32 %v372_v54 }
 0x2db   : > { %v481_v55 = vpop.xlane.xlu0 %480 }
 0x2dc   : > { %v482_v56 = vsub.f32 %v474_v35, %v481_v55 }
 0x2de   : > { %v483_v57 = vmul.f32 1.442695, %v482_v56 }
 0x2e0   : > { %2240 = vpow2.f32 %v483_v57 }
 0x2e2   : > { %v2239_v58 = vpop.eup %2238 }
 0x2e3   : > { %v591_v59 = vpop.xlane.xlu0 %590  ;;  %v374_v60 = vsel %vm321_vm2, %v2239_v58, 0.0 }
 0x2e4   : > { %v592_v61 = vsub.f32 %v584_v41, %v591_v59  ;;  %375 = vadd.xlane.f32.xlu0 %v374_v60  ;;  %v2223_v41 = vld [vmem:[%s2870_s2 + $0x14] ss:$8 sps:$4 sm:$0xff]  }
 0x2e6   : > { %v593_v62 = vmul.f32 1.442695, %v592_v61 }
 0x2e8   : > { %2242 = vpow2.f32 %v593_v62 }
 0x2ea   : > { %v2241_v63 = vpop.eup %2240 }
 0x2eb   : > { %v485_v4 = vsel %vm321_vm2, %v2241_v63, 0.0  ;;  %v701_v10 = vpop.xlane.xlu1 %700 }
 0x2ec   : > { %486 = vadd.xlane.f32.xlu1 %v485_v4  ;;  %v702_v11 = vsub.f32 %v694_v47, %v701_v10 }
 0x2ee   : > { %v703_v12 = vmul.f32 1.442695, %v702_v11 }
 0x2f0   : > { %2244 = vpow2.f32 %v703_v12 }
 0x2f2   : > { %v2243_v5 = vpop.eup %2242 }
 0x2f3   : > { %v595_v9 = vsel %vm321_vm2, %v2243_v5, 0.0 }
 0x2f4   : > { %596 = vadd.xlane.f32.xlu0 %v595_v9 }
 0x2fa   : > { %v2245_v13 = vpop.eup %2244 }
 0x2fb   : > { %v705_v15 = vsel %vm321_vm2, %v2245_v13, 0.0 }
 0x2fd   : > { %491 = vrot.lane.b32.xlu1 %v2488_v14, %s2355_s9 }
 0x30a   : > { %380 = vrot.lane.b32.xlu0 %v2488_v14, %s2356_s11 }
 0x30e   : > { %711 = vrot.lane.b32.xlu0 %v2488_v14, %s2880_s12 }
 0x321   : > { %706 = vadd.xlane.f32.xlu1 %v705_v15 }
 0x332   : > { %601 = vrot.lane.b32.xlu1 %v2488_v14, %s2879_s13 }
 0x336   : > { %781 = vrot.lane.b32.xlu1 %v2445_v0, %s2877_s10 }
 0x371   : > { %v376_v16 = vpop.xlane.xlu0 %375 }
 0x372   : > { %2246 = vrcp.f32 %v376_v16 }
 0x379   : > { %v487_v17 = vpop.xlane.xlu1 %486 }
 0x37a   : > { %2248 = vrcp.f32 %v487_v17 }
 0x37c   : > { %v2247_v18 = vpop.eup %2246 }
 0x37d   : > { %v378_v20 = vmul.f32 %v2247_v18, %v2239_v58  ;;  %v492_v23 = vpop.permute.xlu1 %491 }
 0x37e   : > { %v497_v26 = vsel %vm385_vm3, %v492_v23, 0 }
 0x37f   : > { %v379_v24 = vpack.c.bf16 %v378_v20, %v378_v20 }
 0x381   : > { %v597_v19 = vpop.xlane.xlu0 %596 }
 0x382   : > { %2250 = vrcp.f32 %v597_v19 }
 0x384   : > { %v2249_v25 = vpop.eup %2248 }
 0x385   : > { %v381_v21 = vpop.permute.xlu0 %380  ;;  %v489_v14 = vmul.f32 %v2249_v25, %v2241_v63 }
 0x386   : > { %v387_v22 = vsel %vm385_vm3, %v381_v21, 0 }
 0x387   : > { %2009 = vmatpush3.bf16.msra.mxu0 %v387_v22  ;;  %v490_v28 = vpack.c.bf16 %v489_v14, %v489_v14  ;;  %v852_v14 = vsub.s32 5, %v2477_v6 }
 0x388   : > { %2020 = vmatprep.subr.bf16.mxu0 %v2346_v1 }
 0x389   : > { %v712_v34 = vpop.permute.xlu0 %711 }
 0x38a   : > { %2011 = vmatmul.mubr.msk.bf16.vlgmr.msra.gmra.mrb[0].mxu0 %vm321_vm2, %v379_v24  ;;  %v717_v36 = vsel %vm385_vm3, %v712_v34, 0  ;;  %v2224_v34 = vld [vmem:[%s2871_s3] sm:$0xff]  }
 0x38b   : > { %2021 = vmatpush3.bf16.msra.mxu0 %v497_v26  ;;  %2022 = vmatprep.mubr.msk.bf16.mxu0 %vm2347_vm0, %v2346_v1  ;;  %v847_v26 = vsub.s32 4, %v2477_v6 }
 0x38c   : > { %2032 = vmatprep.subr.bf16.mxu0 %v2346_v1  ;;  %v2251_v29 = vpop.eup %2250 }
 0x38d   : > { %v599_v31 = vmul.f32 %v2251_v29, %v2243_v5  ;;  %v779_v5 = vsub.s32 1, %v2477_v6 }
 0x38f   : > { %v600_v35 = vpack.c.bf16 %v599_v31, %v599_v31  ;;  %v780_v9 = vrot.slane %v2483_v8, %v779_v5 }
 0x392   : > { %2023 = vmatmul.mubr.msk.bf16.vlgmr.msra.gmra.mrb[4].mxu0 %vm321_vm2, %v490_v28 }
 0x393   : > { %2034 = vmatprep.mubr.msk.bf16.mxu0 %vm2347_vm0, %v2346_v1 }
 0x3ae   : > { %v707_v30 = vpop.xlane.xlu1 %706 }
 0x3af   : > { %2252 = vrcp.f32 %v707_v30  ;;  %v853_v30 = vrot.slane %v2483_v8, %v852_v14 }
 0x3b2   : > { %v602_v32 = vpop.permute.xlu1 %601 }
 0x3b3   : > { %v607_v33 = vsel %vm385_vm3, %v602_v32, 0 }
 0x3b4   : > { %2033 = vmatpush3.bf16.msra.mxu0 %v607_v33 }
 0x3b5   : > { %2044 = vmatprep.subr.bf16.mxu0 %v2346_v1 }
 0x3b6   : > { %v782_v42 = vpop.permute.xlu1 %781 }
 0x3b7   : > { %2035 = vmatmul.mubr.msk.bf16.vlgmr.msra.gmra.mrb[8].mxu0 %vm321_vm2, %v600_v35  ;;  %2051 = vmatpush3.bf16.msra.mxu1 %v782_v42  ;;  %v2225_v35 = vld [vmem:[%s2871_s3 + $0x8] sm:$0xff]  }
 0x3b8   : > { %2045 = vmatpush3.bf16.msra.mxu0 %v717_v36  ;;  %2046 = vmatprep.mubr.msk.bf16.mxu0 %vm2347_vm0, %v2346_v1  ;;  %v2226_v36 = vld [vmem:[%s2871_s3 + $0x10] sm:$0xff]  }
 0x3b9   : > { %v2253_v37 = vpop.eup %2252  ;;  %2058 = vmatprep.subr.bf16.mxu0 %v2346_v1  ;;  %2052 = vmatprep.subr.bf16.mxu1 %v2346_v1 }
 0x3ba   : > { %v709_v38 = vmul.f32 %v2253_v37, %v2245_v13  ;;  %v2227_v37 = vld [vmem:[%s2871_s3 + $0x18] sm:$0xff]  }
 0x3bc   : > { %v710_v40 = vpack.c.bf16 %v709_v38, %v709_v38  ;;  %v858_v38 = vsub.s32 2, %v2477_v6 }
 0x3bf   : > { %2047 = vmatmul.mubr.msk.bf16.vlgmr.msra.gmra.mrb[12].mxu0 %vm321_vm2, %v710_v40 }
 0x3c0   : > { %2059 = vmatpush3.bf16.msra.mxu0 %v2220_v39  ;;  %2062 = vmatprep.mubr.msk.bf16.mxu0 %vm2347_vm0, %v2346_v1  ;;  %v859_v39 = vrot.slane %v2483_v8, %v858_v38 }
 0x3c1   : > { %2060 = vmatprep.subr.bf16.mxu0 %v2346_v1 }
 0x3c4   : > { %2061 = vmatpush3.bf16.msra.mxu0 %v2223_v41 }
 0x3c5   : > { %2078 = vmatprep.subr.bf16.mxu0 %v2346_v1 }
 0x45d   : > { %v423_v43 = vpop.f32.mrb[0].mxu0 }
 0x45e   : > { %v2012_v44 = vpop.f32.mrb[1].mxu0 }
 0x45f   : > { %v426_v45 = vpop.f32.mrb[2].mxu0 }
 0x460   : > { %v2013_v46 = vpop.f32.mrb[3].mxu0 }
 0x465   : > { %v533_v47 = vpop.f32.mrb[4].mxu0 }
 0x466   : > { %760 = vrot.lane.b32.xlu0 %v533_v47, %s2876_s14  ;;  %v2024_v48 = vpop.f32.mrb[5].mxu0 }
 0x467   : > { %v536_v49 = vpop.f32.mrb[6].mxu0 }
 0x468   : > { %v2025_v50 = vpop.f32.mrb[7].mxu0 }
 0x48a   : > { %v643_v51 = vpop.f32.mrb[8].mxu0 }
 0x48b   : > { %764 = vrot.lane.b32.xlu1 %v643_v51, %s2875_s15  ;;  %v2036_v0 = vpop.f32.mrb[9].mxu0 }
 0x48c   : > { %v646_v52 = vpop.f32.mrb[10].mxu0 }
 0x48d   : > { %v2037_v53 = vpop.f32.mrb[11].mxu0 }
 0x48f   : > { %783 = vrot.lane.b32.xlu1 %v2455_v2, %s2877_s10 }
 0x492   : > { %v753_v54 = vpop.f32.mrb[12].mxu0 }
 0x493   : > { %768 = vrot.lane.b32.xlu0 %v753_v54, %s2874_s7  ;;  %v2048_v55 = vpop.f32.mrb[13].mxu0  ;;  %v923_v54 = vsub.s32 3, %v2477_v6 }
 0x494   : > { %v756_v56 = vpop.f32.mrb[14].mxu0 }
 0x495   : > { %v2049_v57 = vpop.f32.mrb[15].mxu0  ;;  %v924_v55 = vrot.slane %v2483_v8, %v923_v54 }
 0x4d8   : > { %v761_v59 = vpop.permute.xlu0 %760 }
 0x4d9   : > { %v771_v61 = vsel %vm321_vm2, %v423_v43, %v761_v59 }
 0x4fd   : > { %v765_v58 = vpop.permute.xlu1 %764 }
 0x4fe   : > { %v773_v62 = vsel %vm772_vm4, %v771_v61, %v765_v58 }
 0x501   : > { %v784_v60 = vpop.permute.xlu1 %783 }
 0x502   : > { %2053 = vmatpush3.bf16.msra.mxu1 %v784_v60 }
 0x503   : > { %2066 = vmatprep.subr.bf16.mxu1 %v2346_v1 }
 0x505   : > { %v769_v2 = vpop.permute.xlu0 %768 }
 0x506   : > { %v775_v63 = vsel %vm774_vm5, %v773_v62, %v769_v2 }
 0x507   : > { %v776_v4 = vpack.c.bf16 %v775_v63, %v775_v63 }
 0x509   : > { %2055 = vmatmul.mubr.msk.bf16.vlgmr.msra.gmra.mrb[20].mxu1 %vm267_vm1, %v776_v4 }
 0x50a   : > { %2074 = vmatprep.mubr.msk.bf16.mxu1 %vm2347_vm0, %v2346_v1  ;;  %2067 = vmatpush3.bf16.msra.mxu1 %v2224_v34 }
 0x50b   : > { %2068 = vmatprep.subr.bf16.mxu1 %v2346_v1 }
 0x50e   : > { %2069 = vmatpush3.bf16.msra.mxu1 %v2225_v35 }
 0x50f   : > { %2070 = vmatprep.subr.bf16.mxu1 %v2346_v1 }
 0x512   : > { %2071 = vmatpush3.bf16.msra.mxu1 %v2226_v36 }
 0x513   : > { %2072 = vmatprep.subr.bf16.mxu1 %v2346_v1 }
 0x516   : > { %2073 = vmatpush3.bf16.msra.mxu1 %v2227_v37 }
 0x517   : > { %2092 = vmatprep.subr.bf16.mxu1 %v2346_v1 }
 0x5dc   : > { %v824_v10 = vpop.f32.mrb[20].mxu1 }
 0x5dd   : > { %v825_v11 = vadd.f32 %v824_v10, %v780_v9  ;;  %v2056_v12 = vpop.f32.mrb[21].mxu1 }
 0x5de   : > { %v827_v13 = vpop.f32.mrb[22].mxu1  ;;  %v2651_v12 = vld [vmem:[%s2870_s2 + $0x30] ss:$8 sps:$4 sm:$0xff]  }
 0x5df   : > { %v2057_v15 = vpop.f32.mrb[23].mxu1  ;;  %v830_v16 = vadd.f32 %v825_v11, %v2469_v3  ;;  %v848_v3 = vrot.slane %v2483_v8, %v847_v26  ;;  %v2644_v11 = vld [vmem:[%s2870_s2 + $0x20] ss:$8 sps:$4 sm:$0xff]  }
 0x5e1   : > { %v831_v17 = vsel %vm267_vm1, %v830_v16, 0.0 }
 0x5e2   : > { %832 = vadd.xlane.f32.xlu0 %v831_v17  ;;  %v1009_v17 = vsub.s32 6, %v2477_v6 }
 0x66f   : > { %v833_v18 = vpop.xlane.xlu0 %832 }
 0x670   : > { %v835_v19 = vmul.f32 0.03125, %v833_v18  ;;  %v1014_v18 = vsub.s32 7, %v2477_v6 }
 0x672   : > { %v836_v20 = vsub.f32 %v830_v16, %v835_v19  ;;  %v1010_v19 = vrot.slane %v2483_v8, %v1009_v17 }
 0x674   : > { %v837_v21 = vmul.f32 %v836_v20, %v836_v20 }
 0x676   : > { %v838_v22 = vsel %vm267_vm1, %v837_v21, 0.0 }
 0x677   : > { %839 = vadd.xlane.f32.xlu1 %v838_v22  ;;  %v1015_v22 = vrot.slane %v2483_v8, %v1014_v18 }
 0x704   : > { %v840_v23 = vpop.xlane.xlu1 %839 }
 0x705   : > { %v841_v24 = vmul.f32 0.03125, %v840_v23 }
 0x707   : > { %v842_v25 = vadd.f32 1e-12, %v841_v24 }
 0x709   : > { %2254 = vrsqrt.f32 %v842_v25 }
 0x713   : > { %v2255_v28 = vpop.eup %2254 }
 0x714   : > { %v844_v29 = vmul.f32 %v2255_v28, %v836_v20 }
 0x716   : > { %v849_v31 = vmul.f32 %v848_v3, %v844_v29  ;;  %v2673_v3 = vld [vmem:[%s2872_s4 + $0x8] sm:$0xff] }
 0x717   : > { %v1037_v8 = vrot.slane %v2673_v3, %v253_v7 }
 0x718   : > { %v854_v32 = vadd.f32 %v853_v30, %v849_v31 }
 0x71a   : > { %v855_v33 = vpack.c.bf16 %v854_v32, %v854_v32 }
 0x71c   : > { %2063 = vmatmul.mubr.msk.bf16.vlgmr.msra.gmra.mrb[16].mxu0 %vm267_vm1, %v855_v33 }
 0x71d   : > { %2082 = vmatprep.mubr.msk.bf16.mxu0 %vm2347_vm0, %v2346_v1  ;;  %2079 = vmatpush3.bf16.msra.mxu0 %v2644_v11 }
 0x71e   : > { %2080 = vmatprep.subr.bf16.mxu0 %v2346_v1 }
 0x721   : > { %2081 = vmatpush3.bf16.msra.mxu0 %v2651_v12 }
 0x722   : > { %2086 = vmatprep.subr.bf16.mxu0 %v2346_v1 }
 0x7ef   : > { %v905_v40 = vpop.f32.mrb[16].mxu0 }
 0x7f0   : > { %v906_v41 = vadd.f32 %v905_v40, %v859_v39  ;;  %v2064_v42 = vpop.f32.mrb[17].mxu0 }
 0x7f1   : > { %v908_v43 = vpop.f32.mrb[18].mxu0 }
 0x7f2   : > { %v911_v44 = vmul.f32 %v906_v41, %v906_v41  ;;  %v2065_v45 = vpop.f32.mrb[19].mxu0 }
 0x7f4   : > { %v912_v46 = vmul.f32 %v911_v44, %v906_v41 }
 0x7f6   : > { %v913_v47 = vmul.f32 0.044715, %v912_v46 }
 0x7f8   : > { %v914_v48 = vadd.f32 %v913_v47, %v906_v41 }
 0x7fa   : > { %v915_v49 = vmul.f32 0.7978846, %v914_v48 }
 0x7fc   : > { %2256 = vtanh.f32 %v915_v49 }
 0x806   : > { %v2257_v50 = vpop.eup %2256 }
 0x807   : > { %v917_v51 = vadd.f32 1.0, %v2257_v50 }
 0x809   : > { %v918_v0 = vmul.f32 0.5, %v917_v51 }
 0x80b   : > { %v919_v52 = vmul.f32 %v918_v0, %v906_v41 }
 0x80d   : > { %v920_v53 = vpack.c.bf16 %v919_v52, %v919_v52 }
 0x80f   : > { %2075 = vmatmul.mubr.msk.bf16.vlgmr.msra.gmra.mrb[24].mxu1 %vm949_vm6, %v920_v53 }
 0x810   : > { %2094 = vmatprep.mubr.msk.bf16.mxu1 %vm2347_vm0, %v2346_v1 }
 0x8e2   : > { %v987_v56 = vpop.f32.mrb[24].mxu1 }
 0x8e3   : > { %v988_v57 = vadd.f32 %v987_v56, %v924_v55  ;;  %v2076_v58 = vpop.f32.mrb[25].mxu1 }
 0x8e4   : > { %v990_v59 = vpop.f32.mrb[26].mxu1 }
 0x8e5   : > { %v2077_v60 = vpop.f32.mrb[27].mxu1  ;;  %v993_v61 = vadd.f32 %v988_v57, %v854_v32 }
 0x8e7   : > { %v994_v62 = vsel %vm267_vm1, %v993_v61, 0.0 }
 0x8e8   : > { %995 = vadd.xlane.f32.xlu0 %v994_v62 }
 0x975   : > { %v996_v2 = vpop.xlane.xlu0 %995 }
 0x976   : > { %v997_v63 = vmul.f32 0.03125, %v996_v2 }
 0x978   : > { %v998_v4 = vsub.f32 %v993_v61, %v997_v63 }
 0x97a   : > { %v999_v9 = vmul.f32 %v998_v4, %v998_v4 }
 0x97c   : > { %v1000_v10 = vsel %vm267_vm1, %v999_v9, 0.0 }
 0x97d   : > { %1001 = vadd.xlane.f32.xlu0 %v1000_v10 }
 0xa0a   : > { %v1002_v13 = vpop.xlane.xlu0 %1001 }
 0xa0b   : > { %v1003_v15 = vmul.f32 0.03125, %v1002_v13 }
 0xa0d   : > { %v1004_v16 = vadd.f32 1e-12, %v1003_v15 }
 0xa0f   : > { %2258 = vrsqrt.f32 %v1004_v16 }
 0xa19   : > { %v2259_v20 = vpop.eup %2258 }
 0xa1a   : > { %v1006_v21 = vmul.f32 %v2259_v20, %v998_v4 }
 0xa1c   : > { %v1011_v23 = vmul.f32 %v1010_v19, %v1006_v21 }
 0xa1e   : > { %v2663_v24 = vadd.f32 %v1015_v22, %v1011_v23 }
 0xa20   : > { %v1033_v25 = vpack.c.bf16 %v2663_v24, %v2663_v24 }
 0xa22   : > { %2083 = vmatmul.mubr.msk.bf16.vlgmr.msra.gmra.mrb[20].mxu0 %vm267_vm1, %v1033_v25 }
 0xa23   : > { %2088 = vmatprep.mubr.msk.bf16.mxu0 %vm2347_vm0, %v2346_v1 }
 0xaf5   : > { %v1087_v28 = vpop.f32.mrb[20].mxu0 }
 0xaf6   : > { %v1088_v29 = vadd.f32 %v1087_v28, %v1037_v8  ;;  %v2084_v30 = vpop.f32.mrb[21].mxu0 }
 0xaf7   : > { %v1090_v31 = vpop.f32.mrb[22].mxu0 }
 0xaf8   : > { %v2678_v32 = vpack.c.bf16 %v1088_v29, %v1088_v29  ;;  %v2085_v33 = vpop.f32.mrb[23].mxu0 }
 0xafa   : > { %1205 = vrot.lane.b32.xlu0 %v2678_v32, %s2351_s25  ;;  %1095 = vrot.lane.b32.xlu1 %v2678_v32, %s2349_s17  ;;  %s2884_s17 = smov 48   ;;  %s2886_s25 = smov 8  }
 0xafe   : > { %1313 = vrot.lane.b32.xlu0 %v2678_v32, %s2353_s30  ;;  %1203 = vrot.lane.b32.xlu1 %v2678_v32, %s2348_s16  ;;  %s2883_s16 = smov 40   ;;  %s2888_s30 = smov 24  }
 0xb02   : > { %1423 = vrot.lane.b32.xlu0 %v2678_v32, %s2354_s6  ;;  %1315 = vrot.lane.b32.xlu1 %v2678_v32, %s2350_s23  ;;  %s2885_s23 = smov 32  }
 0xb06   : > { %1425 = vrot.lane.b32.xlu1 %v2678_v32, %s2352_s26  ;;  %s2887_s26 = smov 16  }
 0xb6c   : > { %v1096_v7 = vpop.permute.xlu1 %1095  ;;  %v1206_v35 = vpop.permute.xlu0 %1205 }
 0xb6d   : > { %v1101_v34 = vsel %vm321_vm2, %v1096_v7, 0  ;;  %v1211_v37 = vsel %vm321_vm2, %v1206_v35, 0 }
 0xb6e   : > { %2087 = vmatpush3.bf16.xpose.msra.mxu0 %v1101_v34 }
 0xb6f   : > { %2098 = vmatprep.subr.bf16.mxu0 %v2346_v1 }
 0xb70   : > { %v1204_v36 = vpop.permute.xlu1 %1203  ;;  %v1314_v42 = vpop.permute.xlu0 %1313 }
 0xb74   : > { %v1316_v39 = vpop.permute.xlu1 %1315  ;;  %v1424_v44 = vpop.permute.xlu0 %1423 }
 0xb75   : > { %2089 = vmatmul.mubr.msk.bf16.vlgmr.msra.gmra.mrb[24].mxu0 %vm321_vm2, %v2678_v32  ;;  %v1321_v40 = vsel %vm321_vm2, %v1316_v39, 0 }
 0xb76   : > { %2099 = vmatpush3.bf16.xpose.msra.mxu0 %v1211_v37  ;;  %2100 = vmatprep.mubr.msk.bf16.mxu0 %vm2347_vm0, %v2346_v1 }
 0xb77   : > { %2110 = vmatprep.subr.bf16.mxu0 %v2346_v1 }
 0xb78   : > { %v1426_v41 = vpop.permute.xlu1 %1425 }
 0xb79   : > { %v1431_v43 = vsel %vm321_vm2, %v1426_v41, 0 }
 0xb7d   : > { %2101 = vmatmul.mubr.msk.bf16.vlgmr.msra.gmra.mrb[28].mxu0 %vm321_vm2, %v1204_v36 }
 0xb7e   : > { %2111 = vmatpush3.bf16.xpose.msra.mxu0 %v1321_v40  ;;  %2112 = vmatprep.mubr.msk.bf16.mxu0 %vm2347_vm0, %v2346_v1 }
 0xb7f   : > { %2122 = vmatprep.subr.bf16.mxu0 %v2346_v1 }
 0xb85   : > { %2113 = vmatmul.mubr.msk.bf16.vlgmr.msra.gmra.mrb[32].mxu0 %vm321_vm2, %v1314_v42 }
 0xb86   : > { %2123 = vmatpush3.bf16.xpose.msra.mxu0 %v1431_v43  ;;  %2124 = vmatprep.mubr.msk.bf16.mxu0 %vm2347_vm0, %v2346_v1 }
 0xb87   : > { %2134 = vmatprep.subr.bf16.mxu0 %v2346_v1 }
 0xb8d   : > { %2125 = vmatmul.mubr.msk.bf16.vlgmr.msra.gmra.mrb[36].mxu0 %vm321_vm2, %v1424_v44 }
 0xb8e   : > { %2138 = vmatprep.mubr.msk.bf16.mxu0 %vm2347_vm0, %v2346_v1 }
 0xc48   : > { %v1137_v45 = vpop.f32.mrb[24].mxu0 }
 0xc49   : > { %v1138_v46 = vadd.f32 %v2529_v27, %v1137_v45  ;;  %v2090_v47 = vpop.f32.mrb[25].mxu0 }
 0xc4a   : > { %v1140_v48 = vpop.f32.mrb[26].mxu0 }
 0xc4b   : > { %v2091_v49 = vpop.f32.mrb[27].mxu0  ;;  %v1143_v50 = vsel %vm321_vm2, %v1138_v46, -inf }
 0xc4c   : > { %1144 = vmax.xlane.f32.xlu1 %v1143_v50 }
 0xc50   : > { %v1247_v51 = vpop.f32.mrb[28].mxu0 }
 0xc51   : > { %v1248_v0 = vadd.f32 %v2529_v27, %v1247_v51  ;;  %v2102_v52 = vpop.f32.mrb[29].mxu0 }
 0xc52   : > { %v1250_v53 = vpop.f32.mrb[30].mxu0 }
 0xc53   : > { %v2103_v55 = vpop.f32.mrb[31].mxu0  ;;  %v1253_v56 = vsel %vm321_vm2, %v1248_v0, -inf }
 0xc54   : > { %1254 = vmax.xlane.f32.xlu0 %v1253_v56 }
 0xc58   : > { %v1357_v57 = vpop.f32.mrb[32].mxu0 }
 0xc59   : > { %v1358_v58 = vadd.f32 %v2529_v27, %v1357_v57  ;;  %v2114_v59 = vpop.f32.mrb[33].mxu0 }
 0xc5a   : > { %v1360_v60 = vpop.f32.mrb[34].mxu0 }
 0xc5b   : > { %v2115_v61 = vpop.f32.mrb[35].mxu0  ;;  %v1363_v62 = vsel %vm321_vm2, %v1358_v58, -inf }
 0xc5c   : > { %1364 = vmax.xlane.f32.xlu0 %v1363_v62 }
 0xc60   : > { %v1467_v2 = vpop.f32.mrb[36].mxu0 }
 0xc61   : > { %v1468_v63 = vadd.f32 %v2529_v27, %v1467_v2  ;;  %v2126_v4 = vpop.f32.mrb[37].mxu0 }
 0xc62   : > { %v1470_v9 = vpop.f32.mrb[38].mxu0 }
 0xc63   : > { %v2127_v10 = vpop.f32.mrb[39].mxu0  ;;  %v1473_v13 = vsel %vm321_vm2, %v1468_v63, -inf }
 0xc64   : > { %1474 = vmax.xlane.f32.xlu1 %v1473_v13 }
 0xcd9   : > { %v1145_v15 = vpop.xlane.xlu1 %1144 }
 0xcda   : > { %v1146_v16 = vsub.f32 %v1138_v46, %v1145_v15 }
 0xcdc   : > { %v1147_v19 = vmul.f32 1.442695, %v1146_v16 }
 0xcde   : > { %2260 = vpow2.f32 %v1147_v19 }
 0xce1   : > { %v1255_v20 = vpop.xlane.xlu0 %1254 }
 0xce2   : > { %v1256_v21 = vsub.f32 %v1248_v0, %v1255_v20 }
 0xce4   : > { %v1257_v22 = vmul.f32 1.442695, %v1256_v21 }
 0xce6   : > { %2262 = vpow2.f32 %v1257_v22 }
 0xce8   : > { %v2261_v23 = vpop.eup %2260 }
 0xce9   : > { %v1365_v25 = vpop.xlane.xlu0 %1364  ;;  %v1149_v8 = vsel %vm321_vm2, %v2261_v23, 0.0 }
 0xcea   : > { %v1366_v28 = vsub.f32 %v1358_v58, %v1365_v25  ;;  %1150 = vadd.xlane.f32.xlu0 %v1149_v8 }
 0xcec   : > { %v1367_v27 = vmul.f32 1.442695, %v1366_v28 }
 0xcee   : > { %2264 = vpow2.f32 %v1367_v27 }
 0xcf0   : > { %v2263_v29 = vpop.eup %2262 }
 0xcf1   : > { %v1259_v30 = vsel %vm321_vm2, %v2263_v29, 0.0  ;;  %v1475_v7 = vpop.xlane.xlu1 %1474 }
 0xcf2   : > { %1260 = vadd.xlane.f32.xlu1 %v1259_v30  ;;  %v1476_v34 = vsub.f32 %v1468_v63, %v1475_v7 }
 0xcf4   : > { %v1477_v35 = vmul.f32 1.442695, %v1476_v34  ;;  %v1552_v34 = vrot.slane %v2673_v3, %v779_v5  ;;  %v2232_v5 = vld [vmem:[%s2870_s2 + $0x24] ss:$8 sps:$4 sm:$0xff]  }
 0xcf6   : > { %2266 = vpow2.f32 %v1477_v35 }
 0xcf8   : > { %v2265_v31 = vpop.eup %2264 }
 0xcf9   : > { %v1369_v33 = vsel %vm321_vm2, %v2265_v31, 0.0 }
 0xcfa   : > { %1370 = vadd.xlane.f32.xlu0 %v1369_v33 }
 0xd00   : > { %v2267_v36 = vpop.eup %2266 }
 0xd01   : > { %v1479_v37 = vsel %vm321_vm2, %v2267_v36, 0.0 }
 0xd03   : > { %1265 = vrot.lane.b32.xlu1 %v2678_v32, %s2355_s9 }
 0xd10   : > { %1155 = vrot.lane.b32.xlu0 %v2678_v32, %s2356_s11 }
 0xd14   : > { %1485 = vrot.lane.b32.xlu0 %v2678_v32, %s2883_s16 }
 0xd27   : > { %1480 = vadd.xlane.f32.xlu1 %v1479_v37 }
 0xd38   : > { %1375 = vrot.lane.b32.xlu1 %v2678_v32, %s2884_s17 }
 0xd3c   : > { %1553 = vrot.lane.b32.xlu1 %v2644_v11, %s2885_s23 }
 0xd77   : > { %v1151_v39 = vpop.xlane.xlu0 %1150 }
 0xd78   : > { %2268 = vrcp.f32 %v1151_v39 }
 0xd7f   : > { %v1261_v40 = vpop.xlane.xlu1 %1260 }
 0xd80   : > { %2270 = vrcp.f32 %v1261_v40 }
 0xd82   : > { %v2269_v41 = vpop.eup %2268 }
 0xd83   : > { %v1153_v43 = vmul.f32 %v2269_v41, %v2261_v23  ;;  %v1266_v46 = vpop.permute.xlu1 %1265 }
 0xd84   : > { %v1271_v32 = vsel %vm385_vm3, %v1266_v46, 0 }
 0xd85   : > { %v1154_v47 = vpack.c.bf16 %v1153_v43, %v1153_v43 }
 0xd87   : > { %v1371_v42 = vpop.xlane.xlu0 %1370 }
 0xd88   : > { %2272 = vrcp.f32 %v1371_v42 }
 0xd8a   : > { %v2271_v48 = vpop.eup %2270 }
 0xd8b   : > { %v1156_v44 = vpop.permute.xlu0 %1155  ;;  %v1263_v11 = vmul.f32 %v2271_v48, %v2263_v29 }
 0xd8c   : > { %v1161_v45 = vsel %vm385_vm3, %v1156_v44, 0 }
 0xd8d   : > { %2093 = vmatpush3.bf16.msra.mxu1 %v1161_v45  ;;  %v1264_v49 = vpack.c.bf16 %v1263_v11, %v1263_v11 }
 0xd8e   : > { %2104 = vmatprep.subr.bf16.mxu1 %v2346_v1 }
 0xd8f   : > { %v1486_v55 = vpop.permute.xlu0 %1485 }
 0xd90   : > { %2095 = vmatmul.mubr.msk.bf16.vlgmr.msra.gmra.mrb[28].mxu1 %vm321_vm2, %v1154_v47  ;;  %v1491_v57 = vsel %vm385_vm3, %v1486_v55, 0 }
 0xd91   : > { %2105 = vmatpush3.bf16.msra.mxu1 %v1271_v32  ;;  %2106 = vmatprep.mubr.msk.bf16.mxu1 %vm2347_vm0, %v2346_v1 }
 0xd92   : > { %2116 = vmatprep.subr.bf16.mxu1 %v2346_v1  ;;  %v2273_v50 = vpop.eup %2272 }
 0xd93   : > { %v1373_v0 = vmul.f32 %v2273_v50, %v2265_v31 }
 0xd95   : > { %v1374_v56 = vpack.c.bf16 %v1373_v0, %v1373_v0  ;;  %v1624_v0 = vrot.slane %v2673_v3, %v852_v14  ;;  %v2236_v14 = vld [vmem:[%s2871_s3 + $0x30] sm:$0xff]  }
 0xd98   : > { %2107 = vmatmul.mubr.msk.bf16.vlgmr.msra.gmra.mrb[32].mxu1 %vm321_vm2, %v1264_v49  ;;  %v1619_v49 = vrot.slane %v2673_v3, %v847_v26  ;;  %v2235_v26 = vld [vmem:[%s2871_s3 + $0x28] sm:$0xff]  }
 0xd99   : > { %2118 = vmatprep.mubr.msk.bf16.mxu1 %vm2347_vm0, %v2346_v1 }
 0xdb4   : > { %v1481_v51 = vpop.xlane.xlu1 %1480 }
 0xdb5   : > { %2274 = vrcp.f32 %v1481_v51 }
 0xdb8   : > { %v1376_v52 = vpop.permute.xlu1 %1375 }
 0xdb9   : > { %v1381_v53 = vsel %vm385_vm3, %v1376_v52, 0 }
 0xdba   : > { %2117 = vmatpush3.bf16.msra.mxu1 %v1381_v53 }
 0xdbb   : > { %2128 = vmatprep.subr.bf16.mxu1 %v2346_v1 }
 0xdbc   : > { %v1554_v61 = vpop.permute.xlu1 %1553 }
 0xdbd   : > { %2119 = vmatmul.mubr.msk.bf16.vlgmr.msra.gmra.mrb[36].mxu1 %vm321_vm2, %v1374_v56  ;;  %2135 = vmatpush3.bf16.msra.mxu0 %v1554_v61  ;;  %v2234_v56 = vld [vmem:[%s2871_s3 + $0x20] sm:$0xff]  }
 0xdbe   : > { %2129 = vmatpush3.bf16.msra.mxu1 %v1491_v57  ;;  %2130 = vmatprep.mubr.msk.bf16.mxu1 %vm2347_vm0, %v2346_v1  ;;  %v2237_v57 = vld [vmem:[%s2871_s3 + $0x38] sm:$0xff]  }
 0xdbf   : > { %v2275_v58 = vpop.eup %2274  ;;  %2142 = vmatprep.subr.bf16.mxu1 %v2346_v1  ;;  %2136 = vmatprep.subr.bf16.mxu0 %v2346_v1 }
 0xdc0   : > { %v1483_v59 = vmul.f32 %v2275_v58, %v2267_v36  ;;  %v1630_v58 = vrot.slane %v2673_v3, %v858_v38  ;;  %v1695_v38 = vrot.slane %v2673_v3, %v923_v54 }
 0xdc2   : > { %v1484_v60 = vpack.c.bf16 %v1483_v59, %v1483_v59 }
 0xdc5   : > { %2131 = vmatmul.mubr.msk.bf16.vlgmr.msra.gmra.mrb[40].mxu1 %vm321_vm2, %v1484_v60 }
 0xdc6   : > { %2146 = vmatprep.mubr.msk.bf16.mxu1 %vm2347_vm0, %v2346_v1  ;;  %2143 = vmatpush3.bf16.msra.mxu1 %v2232_v5 }
 0xdc7   : > { %2144 = vmatprep.subr.bf16.mxu1 %v2346_v1 }
 0xe63   : > { %v1197_v62 = vpop.f32.mrb[28].mxu1 }
 0xe64   : > { %v2096_v2 = vpop.f32.mrb[29].mxu1 }
 0xe65   : > { %v1200_v63 = vpop.f32.mrb[30].mxu1 }
 0xe66   : > { %v2097_v4 = vpop.f32.mrb[31].mxu1 }
 0xe6b   : > { %v1307_v9 = vpop.f32.mrb[32].mxu1 }
 0xe6c   : > { %1534 = vrot.lane.b32.xlu0 %v1307_v9, %s2886_s25  ;;  %v2108_v10 = vpop.f32.mrb[33].mxu1 }
 0xe6d   : > { %v1310_v13 = vpop.f32.mrb[34].mxu1 }
 0xe6e   : > { %v2109_v15 = vpop.f32.mrb[35].mxu1 }
 0xe90   : > { %v1417_v16 = vpop.f32.mrb[36].mxu1 }
 0xe91   : > { %1538 = vrot.lane.b32.xlu1 %v1417_v16, %s2887_s26  ;;  %v2120_v19 = vpop.f32.mrb[37].mxu1  ;;  %s1931_s26 = sshll.u32 %s2415_s22, 7  ;;  %s2363_s22 = smov [#allocation2]  }
 0xe92   : > { %v1420_v20 = vpop.f32.mrb[38].mxu1  ;;  %s2825_s7 = scalar_lea.hbm %s2873_s5, %s1931_s26  ;;  %s2286_s10 = sshll.u32 %s2363_s22, 4  ;;  %s2287_s10 = int_to_ptr.vmem [resolvable:$false] %s2286_s10 }
 0xe93   : > { %v2121_v21 = vpop.f32.mrb[39].mxu1  ;;  %s2288_s14 = scalar_lea.vmem %s2287_s10, 256 }
 0xe95   : > { %1555 = vrot.lane.b32.xlu1 %v2651_v12, %s2885_s23  ;;  %s224_s23 = sand.u32 1, %s2336_s19  }
 0xe96   : > { %s1874_s25 = sshll.u32 %s224_s23, 3  ;;  %s1789_s12 = scalar_lea.sflag [#allocation3], %s224_s23 }
 0xe98   : > { %v1527_v22 = vpop.f32.mrb[40].mxu1 }
 0xe99   : > { %1542 = vrot.lane.b32.xlu0 %v1527_v22, %s2888_s30  ;;  %v2132_v23 = vpop.f32.mrb[41].mxu1  ;;  %s226_s30 = scalar_lea.vmem [#allocation2], %s1874_s25 }
 0xe9a   : > { %v1530_v25 = vpop.f32.mrb[42].mxu1  ;;  %s1802_s6 = sshll.u32 %s226_s30, 4  ;;  %s2827_s6 = int_to_ptr.vmem [resolvable:$true] %s1802_s6 }
 0xe9b   : > { %v2133_v8 = vpop.f32.mrb[43].mxu1  ;;  %s2282_s13 = scalar_lea.vmem %s2827_s6, 128  ;;  %p2289_p0 = scmp.lt.s32.totalorder %s2827_s6, %s2287_s10 }
 0xe9c   : > { %p2283_p11 = scmp.ne.s32.totalorder %s2827_s6, %s2282_s13  ;;  %p2290_p1 = scmp.lt.s32.totalorder %s2288_s14, %s2282_s13 }
 0xe9e   : > { %p2284_p12 = pnand %p2283_p11, %p2432_p5  ;;  %p2291_p2 = por %p2290_p1, %p2289_p0 }
 0xea0   : > { %p2285_p13 = pneg %p2284_p12 }
 0xea2   : > { %p2292_p3 = pnand %p2291_p2, %p2285_p13 }
 0xede   : > { %v1535_v27 = vpop.permute.xlu0 %1534 }
 0xedf   : > { %v1545_v30 = vsel %vm321_vm2, %v1197_v62, %v1535_v27 }
 0xf03   : > { %v1539_v28 = vpop.permute.xlu1 %1538 }
 0xf04   : > { %v1546_v31 = vsel %vm772_vm4, %v1545_v30, %v1539_v28 }
 0xf07   : > { %v1556_v29 = vpop.permute.xlu1 %1555 }
 0xf08   : > { %2137 = vmatpush3.bf16.msra.mxu0 %v1556_v29 }
 0xf09   : > { %2150 = vmatprep.subr.bf16.mxu0 %v2346_v1 }
 0xf0b   : > { %v1543_v33 = vpop.permute.xlu0 %1542 }
 0xf0c   : > { %v1547_v7 = vsel %vm774_vm5, %v1546_v31, %v1543_v33 }
 0xf0d   : > { %v1548_v12 = vpack.c.bf16 %v1547_v7, %v1547_v7 }
 0xf0f   : > { %2139 = vmatmul.mubr.msk.bf16.vlgmr.msra.gmra.mrb[40].mxu0 %vm267_vm1, %v1548_v12 }
 0xf10   : > { %2158 = vmatprep.mubr.msk.bf16.mxu0 %vm2347_vm0, %v2346_v1  ;;  %2151 = vmatpush3.bf16.msra.mxu0 %v2234_v56 }
 0xf11   : > { %2152 = vmatprep.subr.bf16.mxu0 %v2346_v1 }
 0xf14   : > { %2153 = vmatpush3.bf16.msra.mxu0 %v2235_v26 }
 0xf15   : > { %2154 = vmatprep.subr.bf16.mxu0 %v2346_v1 }
 0xf18   : > { %2155 = vmatpush3.bf16.msra.mxu0 %v2236_v14 }
 0xf19   : > { %2156 = vmatprep.subr.bf16.mxu0 %v2346_v1 }
 0xf1c   : > { %2157 = vmatpush3.bf16.msra.mxu0 %v2237_v57 }
 0xfe2   : > { %v1596_v35 = vpop.f32.mrb[40].mxu0 }
 0xfe3   : > { %v1597_v36 = vadd.f32 %v1596_v35, %v1552_v34  ;;  %v2140_v37 = vpop.f32.mrb[41].mxu0  ;;  %v1780_v35 = vrot.slane %v2673_v3, %v1009_v17 }
 0xfe4   : > { %v1599_v39 = vpop.f32.mrb[42].mxu0 }
 0xfe5   : > { %v2141_v40 = vpop.f32.mrb[43].mxu0  ;;  %v1602_v41 = vadd.f32 %v1597_v36, %v2663_v24  ;;  %v2233_v24 = vld [vmem:[%s2870_s2 + $0x34] ss:$8 sps:$4 sm:$0xff]   ;;  %v1785_v39 = vrot.slane %v2673_v3, %v1014_v18 }
 0xfe6   : > { %2145 = vmatpush3.bf16.msra.mxu1 %v2233_v24 }
 0xfe7   : > { %v1603_v42 = vsel %vm267_vm1, %v1602_v41, 0.0 }
 0xfe8   : > { %1604 = vadd.xlane.f32.xlu0 %v1603_v42 }
0x1075   : > { %v1605_v43 = vpop.xlane.xlu0 %1604 }
0x1076   : > { %v1606_v44 = vmul.f32 0.03125, %v1605_v43 }
0x1078   : > { %v1607_v45 = vsub.f32 %v1602_v41, %v1606_v44 }
0x107a   : > { %v1608_v46 = vmul.f32 %v1607_v45, %v1607_v45 }
0x107c   : > { %v1609_v47 = vsel %vm267_vm1, %v1608_v46, 0.0 }
0x107d   : > { %1610 = vadd.xlane.f32.xlu1 %v1609_v47 }
0x110a   : > { %v1611_v48 = vpop.xlane.xlu1 %1610 }
0x110b   : > { %v1612_v32 = vmul.f32 0.03125, %v1611_v48 }
0x110d   : > { %v1613_v11 = vadd.f32 1e-12, %v1612_v32 }
0x110f   : > { %2276 = vrsqrt.f32 %v1613_v11 }
0x1119   : > { %v2277_v50 = vpop.eup %2276 }
0x111a   : > { %v1615_v51 = vmul.f32 %v2277_v50, %v1607_v45 }
0x111c   : > { %v1620_v52 = vmul.f32 %v1619_v49, %v1615_v51 }
0x111e   : > { %v1625_v53 = vadd.f32 %v1624_v0, %v1620_v52 }
0x1120   : > { %v1626_v55 = vpack.c.bf16 %v1625_v53, %v1625_v53 }
0x1122   : > { %2147 = vmatmul.mubr.msk.bf16.vlgmr.msra.gmra.mrb[44].mxu1 %vm267_vm1, %v1626_v55 }
0x11f5   : > { %v1676_v59 = vpop.f32.mrb[44].mxu1 }
0x11f6   : > { %v1677_v60 = vadd.f32 %v1676_v59, %v1630_v58  ;;  %v2148_v61 = vpop.f32.mrb[45].mxu1 }
0x11f7   : > { %v1679_v62 = vpop.f32.mrb[46].mxu1 }
0x11f8   : > { %v1682_v2 = vmul.f32 %v1677_v60, %v1677_v60  ;;  %v2149_v63 = vpop.f32.mrb[47].mxu1 }
0x11fa   : > { %v1683_v4 = vmul.f32 %v1682_v2, %v1677_v60 }
0x11fc   : > { %v1684_v9 = vmul.f32 0.044715, %v1683_v4 }
0x11fe   : > { %v1685_v10 = vadd.f32 %v1684_v9, %v1677_v60 }
0x1200   : > { %v1686_v13 = vmul.f32 0.7978846, %v1685_v10 }
0x1202   : > { %2278 = vtanh.f32 %v1686_v13 }
0x120c   : > { %v2279_v1 = vpop.eup %2278 }
0x120d   : > { %v1688_v15 = vadd.f32 1.0, %v2279_v1 }
0x120f   : > { %v1689_v16 = vmul.f32 0.5, %v1688_v15 }
0x1211   : > { %v1690_v19 = vmul.f32 %v1689_v16, %v1677_v60 }
0x1213   : > { %v1691_v20 = vpack.c.bf16 %v1690_v19, %v1690_v19 }
0x1215   : > { %2159 = vmatmul.mubr.msk.bf16.vlgmr.msra.gmra.mrb[44].mxu0 %vm949_vm6, %v1691_v20 }
0x12e8   : > { %v1757_v21 = vpop.f32.mrb[44].mxu0 }
0x12e9   : > { %v1758_v22 = vadd.f32 %v1757_v21, %v1695_v38  ;;  %v2160_v23 = vpop.f32.mrb[45].mxu0 }
0x12ea   : > { %v1760_v25 = vpop.f32.mrb[46].mxu0 }
0x12eb   : > { %v2161_v8 = vpop.f32.mrb[47].mxu0  ;;  %v1763_v28 = vadd.f32 %v1758_v22, %v1625_v53 }
0x12ed   : > { %v1764_v27 = vsel %vm267_vm1, %v1763_v28, 0.0 }
0x12ee   : > { %1765 = vadd.xlane.f32.xlu0 %v1764_v27 }
0x137b   : > { %v1766_v29 = vpop.xlane.xlu0 %1765 }
0x137c   : > { %v1767_v30 = vmul.f32 0.03125, %v1766_v29 }
0x137e   : > { %v1768_v31 = vsub.f32 %v1763_v28, %v1767_v30 }
0x1380   : > { %v1769_v33 = vmul.f32 %v1768_v31, %v1768_v31 }
0x1382   : > { %v1770_v7 = vsel %vm267_vm1, %v1769_v33, 0.0 }
0x1383   : > { %1771 = vadd.xlane.f32.xlu0 %v1770_v7 }
0x1410   : > { %v1772_v12 = vpop.xlane.xlu0 %1771 }
0x1411   : > { %v1773_v54 = vmul.f32 0.03125, %v1772_v12 }
0x1413   : > { %v1774_v34 = vadd.f32 1e-12, %v1773_v54 }
0x1415   : > { %2280 = vrsqrt.f32 %v1774_v34 }
0x141f   : > { %v2281_v36 = vpop.eup %2280 }
0x1420   : > { %v1776_v37 = vmul.f32 %v2281_v36, %v1768_v31 }
0x1422   : > { %v1781_v40 = vmul.f32 %v1780_v35, %v1776_v37 }
0x1424   : > { %v1786_v41 = vadd.f32 %v1785_v39, %v1781_v40 }
0x1426   : > { %1787 = vst.msk [vmem:[%s226_s30] sm:$0xff] %vm267_vm1, %v1786_v41 }
0x1427   : > { %2295 = shalt.err (!%p2292_p3)
}
0x1428   : > { %s2296_s15 = scalar_lea.hbm %s2825_s7, 128  ;;  %s2300_s17 = scalar_lea.hbm %s2873_s5, 256 }
0x1429   : > { %p2297_p4 = scmp.ne.s32.totalorder %s2825_s7, %s2296_s15  ;;  %p2301_p9 = scmp.lt.u32.totalorder %s2825_s7, %s2873_s5 }
0x142a   : > { %p2302_p10 = scmp.lt.u32.totalorder %s2300_s17, %s2296_s15  ;;  %p2304_p12 = scmp.lt.u32.totalorder %s2296_s15, %s2825_s7 }
0x142b   : > { %p2298_p7 = pnand %p2297_p4, %p2432_p5 }
0x142c   : > { %p2303_p11 = por %p2302_p10, %p2301_p9 }
0x142d   : > { %p2299_p8 = pneg %p2298_p7 }
0x142e   : > { %p2305_p13 = por %p2304_p12, %p2303_p11 }
0x1430   : > { %p2306_p0 = pnand %p2305_p13, %p2299_p8 }
0x1432   : > { %2309 = shalt.err (!%p2306_p0)
}
0x1433   : > { %2162 = dma.vmem_to_hbm [thread:$0]  (%p2432_p5), %s2827_s6, 128, %s2825_s7, %s1789_s12  }
0x1434 PF: > { %p2168_p1 = scmp.ge.s32.totalorder %s2344_s21, 2  ;;  %s1814_s26 = sand.u32 1, %s2332_s18  }
0x1435   : > { %s1815_s30 = scalar_lea.sflag [#allocation3], %s1814_s26 }
0x1436   : > { %p2165_p2 = pnand %p2168_p1, %p2436_p6 }
0x1438   : > { %2327 = dma.done.wait (!%p2165_p2), %s1815_s30, 128  }
0x1439   : > { %2329 = vsyncadd (!%p2165_p2), %s1815_s30, 4294967168  ;;  %p15_p3 = scmp.ge.s32.totalorder %s2419_s24, 4   ;;  %s2889_s18 = smov %s2336_s19 }
0x143a   : > { %s2890_s19 = smov %s2340_s20  ;;  %s2891_s20 = smov %s2430_s27 }
0x143b   : > { %s2892_s21 = smov %s2419_s24  ;;  %17 = sbr.rel (!%p15_p3) target bundleno = 3 (0x3), region = 81 }
0x1442   :  { %1820 = vsyncpa [#allocation3], 1 }
0x1443   :  { %1822 = vsyncpa [#allocation3 + $0x1], 1 }

</bundles_post_ra>
